<compile_context>
chip_gen: v5e
topology: v5e:2x2
jax: 0.10.0
libtpu: 0.0.40
codegen_flags: <defaults>
</compile_context>

<pallas_src>
import functools

import jax
import jax.numpy as jnp
from jax import lax
from jax.experimental import pallas as pl
from jax.experimental.pallas import tpu as pltpu


def _round_up(n, m):
    return ((n + m - 1) // m) * m


# ----------------------------------------------------------------------------- kernel ---
def policy_encoder_kernel(x_ref, wih_ref, whh_ref, b_ref,
                          w1_ref, b1_ref, w2_ref, b2_ref,
                          out_ref, xg_ref, *, T, bt, Hp, unrolled):
    """x_ref: [T*bt, D] time-major tile (rows t*bt:(t+1)*bt = batch tile at time t).
    Gates are packed (i, f, o, g), each in its own Hp(=128k)-lane slab."""
    mxu_dt = wih_ref.dtype  # bf16 by default (native MXU input on v5e/v6e/v7x), or f32.

    # ---- Hoisted input projection for ALL timesteps: one big MXU matmul + one bias add.
    #      Written to VMEM scratch so per-step reads are cheap contiguous slab loads.
    xg_ref[...] = (jnp.dot(x_ref[...], wih_ref[...],
                           preferred_element_type=jnp.float32) + b_ref[...])

    h0 = jnp.zeros((bt, Hp), jnp.float32)
    c0 = jnp.zeros((bt, Hp), jnp.float32)

    def step(xg_t, h, c):
        # Only h @ w_hh stays on the serial chain (one matmul / step).
        gates = xg_t + jnp.dot(h.astype(mxu_dt), whh_ref[...],
                               preferred_element_type=jnp.float32)
        # One sigmoid over the contiguous (i, f, o) 3*Hp slab, one tanh over g.
        sig = jax.nn.sigmoid(gates[:, :3 * Hp])
        g_g = jnp.tanh(gates[:, 3 * Hp:])
        # Whole-vreg (128-lane aligned) gate slabs -> no per-step lane shuffles.
        c = sig[:, Hp:2 * Hp] * c + sig[:, :Hp] * g_g
        h = sig[:, 2 * Hp:] * jnp.tanh(c)
        return h, c

    if unrolled:
        # Small T: full unroll (static slices of the scratch slab).
        h, c = h0, c0
        for t in range(T):
            h, c = step(xg_ref[t * bt:(t + 1) * bt, :], h, c)
    else:
        # Large T: bounded unroll to keep vreg pressure (and spills) in check.
        def body(t, carry):
            h, c = carry
            row = pl.multiple_of(t * bt, 8)
            return step(xg_ref[pl.ds(row, bt), :], h, c)
        h, c = lax.fori_loop(0, T, body, (h0, c0), unroll=2)

    # ---- MLP head: Linear -> Swish -> Linear on the final hidden state. ----
    z = jnp.dot(h.astype(mxu_dt), w1_ref[...],
                preferred_element_type=jnp.float32) + b1_ref[...]
    z = z * jax.nn.sigmoid(z)                                   # Swish
    # Lane-dense (128-padded) output store; the wrapper slices the real out_dim.
    out_ref[...] = (jnp.dot(z.astype(mxu_dt), w2_ref[...],
                            preferred_element_type=jnp.float32)
                    + b2_ref[...]).astype(out_ref.dtype)


# ---------------------------------------------------------------------------- wrapper ---
_VMEM_SOFT_CAP = 40 * 1024 * 1024   # headroom under v7x's 64 MiB physical VMEM


def _vmem_bytes(bt, T, D, Hp, Op, mxu_itemsize):
    xg = T * bt * 4 * Hp * 4                                   # f32 gate slab (scratch)
    x_blk = 2 * T * bt * D * mxu_itemsize                      # double-buffered x tile
    out_blk = 2 * bt * Op * 4                                  # double-buffered out tile
    weights = 2 * ((D + Hp) * 4 * Hp + Hp * Hp + Hp * Op) * mxu_itemsize
    biases = 2 * (4 * Hp + Hp + Op) * 4
    return xg + x_blk + out_blk + weights + biases


def _choose_bt(B, batch_tile):
    """Batch tile such that the 'parallel' grid has >=2 steps when B allows it, so both
    v7x TensorCores get work (no-op on 1-TC v5e/v6e)."""
    bp8 = _round_up(max(B, 1), 8)
    bt = _round_up(-(-bp8 // 2), 8)          # ceil(bp8/2) rounded up to 8 sublanes
    return max(8, min(bt, batch_tile, bp8))


def policy_encoder(x, kp, *, batch_tile=128, unroll_T=16):
    """x: [B, T, input_dim] (batch_first, same as the PyTorch module).
    kp: packed params from pack_params() (gate order (i,f,o,g), lane-padded slabs)."""
    meta = kp["meta"]
    Hp, Op, out_dim = meta["Hp"], meta["Op"], meta["out_dim"]
    B, T, D = x.shape
    mxu_dt = kp["w_ih"].dtype
    isz = jnp.dtype(mxu_dt).itemsize

    bt = _choose_bt(B, batch_tile)
    # VMEM budget (first binding on v7x's 64 MiB): shrink the batch tile if the
    # precomputed [T*bt, 4Hp] gate slab + double-buffered tiles/weights overflow.
    while bt > 8 and _vmem_bytes(bt, T, D, Hp, Op, isz) > _VMEM_SOFT_CAP:
        bt = max(8, _round_up(bt // 2, 8))
    # TODO(synk): for very long T where even bt=8 exceeds the budget, add a T grid axis
    # ("arbitrary") streaming x/xg with h,c held in VMEM scratch across steps.

    Bp = _round_up(B, bt)
    nb = Bp // bt

    # ---- Layout plumbing (all in the wrapper, none in the kernel): time-major, batch
    #      padded/tiled, already in the MXU dtype so the kernel never casts x.
    xt = jnp.transpose(x.astype(mxu_dt), (1, 0, 2))            # [T, B, D]
    if Bp != B:
        xt = jnp.pad(xt, ((0, 0), (0, Bp - B), (0, 0)))
    # [nb, T*bt, D]: tile n, row t*bt + j  ==  batch n*bt + j at time t.
    x2d = xt.reshape(T, nb, bt, D).transpose(1, 0, 2, 3).reshape(nb, T * bt, D)

    kernel = functools.partial(policy_encoder_kernel, T=T, bt=bt, Hp=Hp,
                               unrolled=(T <= unroll_T))

    est = _vmem_bytes(bt, T, D, Hp, Op, isz)
    vmem_limit = int(min(max(2 * est, 32 * 1024 * 1024), 64 * 1024 * 1024))

    def full(a):
        # Constant-index weight/bias specs; at production hidden sizes these could be
        # single-buffered (pipeline_mode=pl.Buffered(1)) to halve weight VMEM.
        return pl.BlockSpec(a.shape, lambda i, _nd=a.ndim: (0,) * _nd)

    out = pl.pallas_call(
        kernel,
        out_shape=jax.ShapeDtypeStruct((Bp, Op), jnp.float32),
        grid=(nb,),
        in_specs=[pl.BlockSpec((None, T * bt, D), lambda i: (i, 0, 0)),
                  full(kp["w_ih"]), full(kp["w_hh"]), full(kp["b"]),
                  full(kp["w1"]), full(kp["b1"]),
                  full(kp["w2"]), full(kp["b2"])],
        out_specs=pl.BlockSpec((bt, Op), lambda i: (i, 0)),
        scratch_shapes=[pltpu.VMEM((T * bt, 4 * Hp), jnp.float32)],
        compiler_params=pltpu.CompilerParams(
            dimension_semantics=("parallel",),
            vmem_limit_bytes=vmem_limit),
    )(x2d, kp["w_ih"], kp["w_hh"], kp["b"],
      kp["w1"], kp["b1"], kp["w2"], kp["b2"])
    return out[:B, :out_dim]


# ----------------------------------------------------------------------------- params ---
def init_params(key, input_dim, latent_dim, hidden_dim):
    """PyTorch-equivalent parameters (gate order (i, f, g, o), activations@weights layout);
    b = b_ih + b_hh."""
    ks = jax.random.split(key, 8)
    s = 1.0 / jnp.sqrt(hidden_dim)
    u = lambda k, shape: jax.random.uniform(k, shape, jnp.float32, -s, s)
    w_ih = u(ks[0], (input_dim, 4 * hidden_dim))
    w_hh = u(ks[1], (hidden_dim, 4 * hidden_dim))
    b_ih = u(ks[2], (1, 4 * hidden_dim))
    b_hh = u(ks[3], (1, 4 * hidden_dim))
    w1 = u(ks[4], (hidden_dim, hidden_dim))
    b1 = u(ks[5], (1, hidden_dim))
    w2 = u(ks[6], (hidden_dim, 2 * latent_dim))
    b2 = u(ks[7], (1, 2 * latent_dim))
    return dict(w_ih=w_ih, w_hh=w_hh, b=b_ih + b_hh, w1=w1, b1=b1, w2=w2, b2=b2)


def pack_params(p, hidden_dim, mxu_dtype=jnp.bfloat16):
    """Kernel-side packing:
      * gate column order (i,f,g,o) -> (i,f,o,g),
      * each gate zero-padded to its own Hp=round_up(H,128) lane slab (whole-vreg slices),
      * MLP weights zero-padded to lane-aligned slabs, output padded to 128 lanes,
      * MXU operands cast to bf16 (native MXU input on v5e/v6e/v7x); biases stay f32."""
    H = hidden_dim
    Hp = _round_up(H, 128)
    out_dim = p["w2"].shape[1]
    Op = _round_up(out_dim, 128)

    # PyTorch gate order (i, f, g, o) -> kernel order (i, f, o, g).
    gate_cols = [slice(0, H), slice(H, 2 * H), slice(3 * H, 4 * H), slice(2 * H, 3 * H)]

    def pad_gates(w):  # [R, 4H] -> [R, 4Hp], each gate in its own 128-lane-aligned slab
        out = jnp.zeros((w.shape[0], 4 * Hp), w.dtype)
        for g, sl in enumerate(gate_cols):
            out = out.at[:, g * Hp:g * Hp + H].set(w[:, sl])
        return out

    w_ih = pad_gates(p["w_ih"])                                            # [D, 4Hp]
    w_hh = jnp.zeros((Hp, 4 * Hp), jnp.float32).at[:H].set(pad_gates(p["w_hh"]))
    b = pad_gates(p["b"])                                                  # [1, 4Hp]
    w1 = jnp.zeros((Hp, Hp), jnp.float32).at[:H, :H].set(p["w1"])
    b1 = jnp.zeros((1, Hp), jnp.float32).at[:, :H].set(p["b1"])
    w2 = jnp.zeros((Hp, Op), jnp.float32).at[:H, :out_dim].set(p["w2"])
    b2 = jnp.zeros((1, Op), jnp.float32).at[:, :out_dim].set(p["b2"])

    return dict(
        w_ih=w_ih.astype(mxu_dtype), w_hh=w_hh.astype(mxu_dtype), b=b.astype(jnp.float32),
        w1=w1.astype(mxu_dtype), b1=b1, w2=w2.astype(mxu_dtype), b2=b2,
        meta=dict(H=H, Hp=Hp, out_dim=out_dim, Op=Op),
    )


# -------------------------------------------------------------------------- reference ---
def policy_encoder_ref(x, p):
    """Pure-JAX reference of the PyTorch forward (PyTorch gate order), for checking."""
    B, T, _ = x.shape
    H = p["w_hh"].shape[0]
    h = jnp.zeros((B, H), jnp.float32)
    c = jnp.zeros((B, H), jnp.float32)
    for t in range(T):
        g = x[:, t, :] @ p["w_ih"] + h @ p["w_hh"] + p["b"]
        i = jax.nn.sigmoid(g[:, :H])
        f = jax.nn.sigmoid(g[:, H:2 * H])
        gg = jnp.tanh(g[:, 2 * H:3 * H])
        o = jax.nn.sigmoid(g[:, 3 * H:])
        c = f * c + i * gg
        h = o * jnp.tanh(c)
    z = h @ p["w1"] + p["b1"]
    z = z * jax.nn.sigmoid(z)
    return z @ p["w2"] + p["b2"]


if __name__ == "__main__":
    B, T = 2, 8                          # batch, sequence length
    input_dim, latent_dim, hidden_dim = 8, 16, 32

    key = jax.random.PRNGKey(0)
    k_x, k_p = jax.random.split(key)
    x = jax.random.normal(k_x, (B, T, input_dim), jnp.float32)
    params = init_params(k_p, input_dim, latent_dim, hidden_dim)
    ref = policy_encoder_ref(x, params)

    # f32-operand MXU path: strict numerical check (padding is exact zeros).
    kp_f32 = pack_params(params, hidden_dim, mxu_dtype=jnp.float32)
    out_f32 = jax.block_until_ready(policy_encoder(x, kp_f32))
    assert out_f32.shape == (B, 2 * latent_dim)
    assert jnp.allclose(out_f32, ref, rtol=1e-5, atol=1e-5), "f32 mismatch vs reference"

    # bf16-operand MXU path (default; native MXU input on v5e/v6e/v7x).
    # f32 accumulation + f32 VPU/EUP elementwise math are kept in the kernel.
    kp_bf16 = pack_params(params, hidden_dim)       # mxu_dtype defaults to bf16
    out_bf16 = jax.block_until_ready(policy_encoder(x, kp_bf16))
    assert jnp.allclose(out_bf16, ref, rtol=5e-2, atol=5e-2), "bf16 mismatch vs reference"

    print("KERNEL_OK")
</pallas_src>

<mosaic_0001>
module attributes {stable_mosaic.version = 11 : i64} {
  func.func @policy_encoder_kernel(%arg0: i32, %arg1: memref<1x64x8xf32, #tpu.memory_space<vmem>>, %arg2: memref<8x512xf32, #tpu.memory_space<vmem>>, %arg3: memref<128x512xf32, #tpu.memory_space<vmem>>, %arg4: memref<1x512xf32, #tpu.memory_space<vmem>>, %arg5: memref<128x128xf32, #tpu.memory_space<vmem>>, %arg6: memref<1x128xf32, #tpu.memory_space<vmem>>, %arg7: memref<128x128xf32, #tpu.memory_space<vmem>>, %arg8: memref<1x128xf32, #tpu.memory_space<vmem>>, %arg9: memref<8x128xf32, #tpu.memory_space<vmem>>, %arg10: memref<64x512xf32, #tpu.memory_space<vmem>>) attributes {dimension_semantics = [#tpu.dimension_semantics<parallel>], iteration_bounds = array<i64: 1>, scalar_prefetch = 0 : i64, scratch_operands = 1 : i64, tpu.core_type = #tpu.core_type<tc>, window_params = [{transform_indices = @transform_0, window_bounds = array<i64: 1, 64, 8>}, {pipeline_mode = #tpu.pipeline_mode<synchronous>, transform_indices = @transform_1, window_bounds = array<i64: 8, 512>}, {pipeline_mode = #tpu.pipeline_mode<synchronous>, transform_indices = @transform_2, window_bounds = array<i64: 128, 512>}, {pipeline_mode = #tpu.pipeline_mode<synchronous>, transform_indices = @transform_3, window_bounds = array<i64: 1, 512>}, {pipeline_mode = #tpu.pipeline_mode<synchronous>, transform_indices = @transform_4, window_bounds = array<i64: 128, 128>}, {pipeline_mode = #tpu.pipeline_mode<synchronous>, transform_indices = @transform_5, window_bounds = array<i64: 1, 128>}, {pipeline_mode = #tpu.pipeline_mode<synchronous>, transform_indices = @transform_6, window_bounds = array<i64: 128, 128>}, {pipeline_mode = #tpu.pipeline_mode<synchronous>, transform_indices = @transform_7, window_bounds = array<i64: 1, 128>}, {transform_indices = @transform_8, window_bounds = array<i64: 8, 128>}]} {
    %c0 = arith.constant 0 : index
    %c0_0 = arith.constant 0 : index
    %c0_1 = arith.constant 0 : index
    %0 = vector.load %arg1[%c0, %c0_0, %c0_1] : memref<1x64x8xf32, #tpu.memory_space<vmem>>, vector<1x64x8xf32>
    %1 = vector.shape_cast %0 : vector<1x64x8xf32> to vector<64x8xf32>
    %c0_2 = arith.constant 0 : index
    %c0_3 = arith.constant 0 : index
    %2 = vector.load %arg2[%c0_2, %c0_3] : memref<8x512xf32, #tpu.memory_space<vmem>>, vector<8x512xf32>
    %cst = arith.constant dense<0.000000e+00> : vector<64x512xf32>
    %3 = tpu.matmul %1, %2, %cst {dimension_numbers = #tpu.dot_dimension_numbers<[1], [0], [0], [1], [0, 0, 1, 1], [], []>} : vector<64x8xf32>, vector<8x512xf32>, vector<64x512xf32> -> vector<64x512xf32>
    %c0_4 = arith.constant 0 : index
    %c0_5 = arith.constant 0 : index
    %4 = vector.load %arg4[%c0_4, %c0_5] : memref<1x512xf32, #tpu.memory_space<vmem>>, vector<1x512xf32>
    %5 = vector.broadcast %4 : vector<1x512xf32> to vector<64x512xf32>
    %6 = arith.addf %3, %5 : vector<64x512xf32>
    %c0_6 = arith.constant 0 : index
    %c0_7 = arith.constant 0 : index
    %7 = vector.load %arg10[%c0_6, %c0_7] : memref<64x512xf32, #tpu.memory_space<vmem>>, vector<64x512xf32>
    tpu.vector_store %arg10[%c0_6, %c0_7], %6 {strides = array<i32>} : memref<64x512xf32, #tpu.memory_space<vmem>>, vector<64x512xf32>,
    %cst_8 = arith.constant 0.000000e+00 : f32
    %8 = vector.broadcast %cst_8 : f32 to vector<8x128xf32>
    %cst_9 = arith.constant 0.000000e+00 : f32
    %9 = vector.broadcast %cst_9 : f32 to vector<8x128xf32>
    %c0_10 = arith.constant 0 : index
    %c0_11 = arith.constant 0 : index
    %10 = vector.load %arg10[%c0_10, %c0_11] : memref<64x512xf32, #tpu.memory_space<vmem>>, vector<8x512xf32>
    %c0_12 = arith.constant 0 : index
    %c0_13 = arith.constant 0 : index
    %11 = vector.load %arg3[%c0_12, %c0_13] : memref<128x512xf32, #tpu.memory_space<vmem>>, vector<128x512xf32>
    %cst_14 = arith.constant dense<0.000000e+00> : vector<8x512xf32>
    %12 = tpu.matmul %8, %11, %cst_14 {dimension_numbers = #tpu.dot_dimension_numbers<[1], [0], [0], [1], [0, 0, 1, 1], [], []>} : vector<8x128xf32>, vector<128x512xf32>, vector<8x512xf32> -> vector<8x512xf32>
    %13 = arith.addf %10, %12 : vector<8x512xf32>
    %14 = vector.extract_strided_slice %13 {offsets = [0, 0], sizes = [8, 384], strides = [1, 1]} : vector<8x512xf32> to vector<8x384xf32>
    %15 = arith.negf %14 : vector<8x384xf32>
    %16 = math.exp %15 : vector<8x384xf32>
    %cst_15 = arith.constant 1.000000e+00 : f32
    %17 = vector.broadcast %cst_15 : f32 to vector<8x384xf32>
    %18 = arith.addf %17, %16 : vector<8x384xf32>
    %19 = arith.divf %17, %18 : vector<8x384xf32>
    %20 = vector.extract_strided_slice %13 {offsets = [0, 384], sizes = [8, 128], strides = [1, 1]} : vector<8x512xf32> to vector<8x128xf32>
    %21 = math.tanh %20 : vector<8x128xf32>
    %22 = vector.extract_strided_slice %19 {offsets = [0, 128], sizes = [8, 128], strides = [1, 1]} : vector<8x384xf32> to vector<8x128xf32>
    %23 = arith.mulf %22, %9 : vector<8x128xf32>
    %24 = vector.extract_strided_slice %19 {offsets = [0, 0], sizes = [8, 128], strides = [1, 1]} : vector<8x384xf32> to vector<8x128xf32>
    %25 = arith.mulf %24, %21 : vector<8x128xf32>
    %26 = arith.addf %23, %25 : vector<8x128xf32>
    %27 = vector.extract_strided_slice %19 {offsets = [0, 256], sizes = [8, 128], strides = [1, 1]} : vector<8x384xf32> to vector<8x128xf32>
    %28 = math.tanh %26 : vector<8x128xf32>
    %29 = arith.mulf %27, %28 : vector<8x128xf32>
    %c8 = arith.constant 8 : index
    %c0_16 = arith.constant 0 : index
    %30 = vector.load %arg10[%c8, %c0_16] : memref<64x512xf32, #tpu.memory_space<vmem>>, vector<8x512xf32>
    %c0_17 = arith.constant 0 : index
    %c0_18 = arith.constant 0 : index
    %31 = vector.load %arg3[%c0_17, %c0_18] : memref<128x512xf32, #tpu.memory_space<vmem>>, vector<128x512xf32>
    %cst_19 = arith.constant dense<0.000000e+00> : vector<8x512xf32>
    %32 = tpu.matmul %29, %31, %cst_19 {dimension_numbers = #tpu.dot_dimension_numbers<[1], [0], [0], [1], [0, 0, 1, 1], [], []>} : vector<8x128xf32>, vector<128x512xf32>, vector<8x512xf32> -> vector<8x512xf32>
    %33 = arith.addf %30, %32 : vector<8x512xf32>
    %34 = vector.extract_strided_slice %33 {offsets = [0, 0], sizes = [8, 384], strides = [1, 1]} : vector<8x512xf32> to vector<8x384xf32>
    %35 = arith.negf %34 : vector<8x384xf32>
    %36 = math.exp %35 : vector<8x384xf32>
    %cst_20 = arith.constant 1.000000e+00 : f32
    %37 = vector.broadcast %cst_20 : f32 to vector<8x384xf32>
    %38 = arith.addf %37, %36 : vector<8x384xf32>
    %39 = arith.divf %37, %38 : vector<8x384xf32>
    %40 = vector.extract_strided_slice %33 {offsets = [0, 384], sizes = [8, 128], strides = [1, 1]} : vector<8x512xf32> to vector<8x128xf32>
    %41 = math.tanh %40 : vector<8x128xf32>
    %42 = vector.extract_strided_slice %39 {offsets = [0, 128], sizes = [8, 128], strides = [1, 1]} : vector<8x384xf32> to vector<8x128xf32>
    %43 = arith.mulf %42, %26 : vector<8x128xf32>
    %44 = vector.extract_strided_slice %39 {offsets = [0, 0], sizes = [8, 128], strides = [1, 1]} : vector<8x384xf32> to vector<8x128xf32>
    %45 = arith.mulf %44, %41 : vector<8x128xf32>
    %46 = arith.addf %43, %45 : vector<8x128xf32>
    %47 = vector.extract_strided_slice %39 {offsets = [0, 256], sizes = [8, 128], strides = [1, 1]} : vector<8x384xf32> to vector<8x128xf32>
    %48 = math.tanh %46 : vector<8x128xf32>
    %49 = arith.mulf %47, %48 : vector<8x128xf32>
    %c16 = arith.constant 16 : index
    %c0_21 = arith.constant 0 : index
    %50 = vector.load %arg10[%c16, %c0_21] : memref<64x512xf32, #tpu.memory_space<vmem>>, vector<8x512xf32>
    %c0_22 = arith.constant 0 : index
    %c0_23 = arith.constant 0 : index
    %51 = vector.load %arg3[%c0_22, %c0_23] : memref<128x512xf32, #tpu.memory_space<vmem>>, vector<128x512xf32>
    %cst_24 = arith.constant dense<0.000000e+00> : vector<8x512xf32>
    %52 = tpu.matmul %49, %51, %cst_24 {dimension_numbers = #tpu.dot_dimension_numbers<[1], [0], [0], [1], [0, 0, 1, 1], [], []>} : vector<8x128xf32>, vector<128x512xf32>, vector<8x512xf32> -> vector<8x512xf32>
    %53 = arith.addf %50, %52 : vector<8x512xf32>
    %54 = vector.extract_strided_slice %53 {offsets = [0, 0], sizes = [8, 384], strides = [1, 1]} : vector<8x512xf32> to vector<8x384xf32>
    %55 = arith.negf %54 : vector<8x384xf32>
    %56 = math.exp %55 : vector<8x384xf32>
    %cst_25 = arith.constant 1.000000e+00 : f32
    %57 = vector.broadcast %cst_25 : f32 to vector<8x384xf32>
    %58 = arith.addf %57, %56 : vector<8x384xf32>
    %59 = arith.divf %57, %58 : vector<8x384xf32>
    %60 = vector.extract_strided_slice %53 {offsets = [0, 384], sizes = [8, 128], strides = [1, 1]} : vector<8x512xf32> to vector<8x128xf32>
    %61 = math.tanh %60 : vector<8x128xf32>
    %62 = vector.extract_strided_slice %59 {offsets = [0, 128], sizes = [8, 128], strides = [1, 1]} : vector<8x384xf32> to vector<8x128xf32>
    %63 = arith.mulf %62, %46 : vector<8x128xf32>
    %64 = vector.extract_strided_slice %59 {offsets = [0, 0], sizes = [8, 128], strides = [1, 1]} : vector<8x384xf32> to vector<8x128xf32>
    %65 = arith.mulf %64, %61 : vector<8x128xf32>
    %66 = arith.addf %63, %65 : vector<8x128xf32>
    %67 = vector.extract_strided_slice %59 {offsets = [0, 256], sizes = [8, 128], strides = [1, 1]} : vector<8x384xf32> to vector<8x128xf32>
    %68 = math.tanh %66 : vector<8x128xf32>
    %69 = arith.mulf %67, %68 : vector<8x128xf32>
    %c24 = arith.constant 24 : index
    %c0_26 = arith.constant 0 : index
    %70 = vector.load %arg10[%c24, %c0_26] : memref<64x512xf32, #tpu.memory_space<vmem>>, vector<8x512xf32>
    %c0_27 = arith.constant 0 : index
    %c0_28 = arith.constant 0 : index
    %71 = vector.load %arg3[%c0_27, %c0_28] : memref<128x512xf32, #tpu.memory_space<vmem>>, vector<128x512xf32>
    %cst_29 = arith.constant dense<0.000000e+00> : vector<8x512xf32>
    %72 = tpu.matmul %69, %71, %cst_29 {dimension_numbers = #tpu.dot_dimension_numbers<[1], [0], [0], [1], [0, 0, 1, 1], [], []>} : vector<8x128xf32>, vector<128x512xf32>, vector<8x512xf32> -> vector<8x512xf32>
    %73 = arith.addf %70, %72 : vector<8x512xf32>
    %74 = vector.extract_strided_slice %73 {offsets = [0, 0], sizes = [8, 384], strides = [1, 1]} : vector<8x512xf32> to vector<8x384xf32>
    %75 = arith.negf %74 : vector<8x384xf32>
    %76 = math.exp %75 : vector<8x384xf32>
    %cst_30 = arith.constant 1.000000e+00 : f32
    %77 = vector.broadcast %cst_30 : f32 to vector<8x384xf32>
    %78 = arith.addf %77, %76 : vector<8x384xf32>
    %79 = arith.divf %77, %78 : vector<8x384xf32>
    %80 = vector.extract_strided_slice %73 {offsets = [0, 384], sizes = [8, 128], strides = [1, 1]} : vector<8x512xf32> to vector<8x128xf32>
    %81 = math.tanh %80 : vector<8x128xf32>
    %82 = vector.extract_strided_slice %79 {offsets = [0, 128], sizes = [8, 128], strides = [1, 1]} : vector<8x384xf32> to vector<8x128xf32>
    %83 = arith.mulf %82, %66 : vector<8x128xf32>
    %84 = vector.extract_strided_slice %79 {offsets = [0, 0], sizes = [8, 128], strides = [1, 1]} : vector<8x384xf32> to vector<8x128xf32>
    %85 = arith.mulf %84, %81 : vector<8x128xf32>
    %86 = arith.addf %83, %85 : vector<8x128xf32>
    %87 = vector.extract_strided_slice %79 {offsets = [0, 256], sizes = [8, 128], strides = [1, 1]} : vector<8x384xf32> to vector<8x128xf32>
    %88 = math.tanh %86 : vector<8x128xf32>
    %89 = arith.mulf %87, %88 : vector<8x128xf32>
    %c32 = arith.constant 32 : index
    %c0_31 = arith.constant 0 : index
    %90 = vector.load %arg10[%c32, %c0_31] : memref<64x512xf32, #tpu.memory_space<vmem>>, vector<8x512xf32>
    %c0_32 = arith.constant 0 : index
    %c0_33 = arith.constant 0 : index
    %91 = vector.load %arg3[%c0_32, %c0_33] : memref<128x512xf32, #tpu.memory_space<vmem>>, vector<128x512xf32>
    %cst_34 = arith.constant dense<0.000000e+00> : vector<8x512xf32>
    %92 = tpu.matmul %89, %91, %cst_34 {dimension_numbers = #tpu.dot_dimension_numbers<[1], [0], [0], [1], [0, 0, 1, 1], [], []>} : vector<8x128xf32>, vector<128x512xf32>, vector<8x512xf32> -> vector<8x512xf32>
    %93 = arith.addf %90, %92 : vector<8x512xf32>
    %94 = vector.extract_strided_slice %93 {offsets = [0, 0], sizes = [8, 384], strides = [1, 1]} : vector<8x512xf32> to vector<8x384xf32>
    %95 = arith.negf %94 : vector<8x384xf32>
    %96 = math.exp %95 : vector<8x384xf32>
    %cst_35 = arith.constant 1.000000e+00 : f32
    %97 = vector.broadcast %cst_35 : f32 to vector<8x384xf32>
    %98 = arith.addf %97, %96 : vector<8x384xf32>
    %99 = arith.divf %97, %98 : vector<8x384xf32>
    %100 = vector.extract_strided_slice %93 {offsets = [0, 384], sizes = [8, 128], strides = [1, 1]} : vector<8x512xf32> to vector<8x128xf32>
    %101 = math.tanh %100 : vector<8x128xf32>
    %102 = vector.extract_strided_slice %99 {offsets = [0, 128], sizes = [8, 128], strides = [1, 1]} : vector<8x384xf32> to vector<8x128xf32>
    %103 = arith.mulf %102, %86 : vector<8x128xf32>
    %104 = vector.extract_strided_slice %99 {offsets = [0, 0], sizes = [8, 128], strides = [1, 1]} : vector<8x384xf32> to vector<8x128xf32>
    %105 = arith.mulf %104, %101 : vector<8x128xf32>
    %106 = arith.addf %103, %105 : vector<8x128xf32>
    %107 = vector.extract_strided_slice %99 {offsets = [0, 256], sizes = [8, 128], strides = [1, 1]} : vector<8x384xf32> to vector<8x128xf32>
    %108 = math.tanh %106 : vector<8x128xf32>
    %109 = arith.mulf %107, %108 : vector<8x128xf32>
    %c40 = arith.constant 40 : index
    %c0_36 = arith.constant 0 : index
    %110 = vector.load %arg10[%c40, %c0_36] : memref<64x512xf32, #tpu.memory_space<vmem>>, vector<8x512xf32>
    %c0_37 = arith.constant 0 : index
    %c0_38 = arith.constant 0 : index
    %111 = vector.load %arg3[%c0_37, %c0_38] : memref<128x512xf32, #tpu.memory_space<vmem>>, vector<128x512xf32>
    %cst_39 = arith.constant dense<0.000000e+00> : vector<8x512xf32>
    %112 = tpu.matmul %109, %111, %cst_39 {dimension_numbers = #tpu.dot_dimension_numbers<[1], [0], [0], [1], [0, 0, 1, 1], [], []>} : vector<8x128xf32>, vector<128x512xf32>, vector<8x512xf32> -> vector<8x512xf32>
    %113 = arith.addf %110, %112 : vector<8x512xf32>
    %114 = vector.extract_strided_slice %113 {offsets = [0, 0], sizes = [8, 384], strides = [1, 1]} : vector<8x512xf32> to vector<8x384xf32>
    %115 = arith.negf %114 : vector<8x384xf32>
    %116 = math.exp %115 : vector<8x384xf32>
    %cst_40 = arith.constant 1.000000e+00 : f32
    %117 = vector.broadcast %cst_40 : f32 to vector<8x384xf32>
    %118 = arith.addf %117, %116 : vector<8x384xf32>
    %119 = arith.divf %117, %118 : vector<8x384xf32>
    %120 = vector.extract_strided_slice %113 {offsets = [0, 384], sizes = [8, 128], strides = [1, 1]} : vector<8x512xf32> to vector<8x128xf32>
    %121 = math.tanh %120 : vector<8x128xf32>
    %122 = vector.extract_strided_slice %119 {offsets = [0, 128], sizes = [8, 128], strides = [1, 1]} : vector<8x384xf32> to vector<8x128xf32>
    %123 = arith.mulf %122, %106 : vector<8x128xf32>
    %124 = vector.extract_strided_slice %119 {offsets = [0, 0], sizes = [8, 128], strides = [1, 1]} : vector<8x384xf32> to vector<8x128xf32>
    %125 = arith.mulf %124, %121 : vector<8x128xf32>
    %126 = arith.addf %123, %125 : vector<8x128xf32>
    %127 = vector.extract_strided_slice %119 {offsets = [0, 256], sizes = [8, 128], strides = [1, 1]} : vector<8x384xf32> to vector<8x128xf32>
    %128 = math.tanh %126 : vector<8x128xf32>
    %129 = arith.mulf %127, %128 : vector<8x128xf32>
    %c48 = arith.constant 48 : index
    %c0_41 = arith.constant 0 : index
    %130 = vector.load %arg10[%c48, %c0_41] : memref<64x512xf32, #tpu.memory_space<vmem>>, vector<8x512xf32>
    %c0_42 = arith.constant 0 : index
    %c0_43 = arith.constant 0 : index
    %131 = vector.load %arg3[%c0_42, %c0_43] : memref<128x512xf32, #tpu.memory_space<vmem>>, vector<128x512xf32>
    %cst_44 = arith.constant dense<0.000000e+00> : vector<8x512xf32>
    %132 = tpu.matmul %129, %131, %cst_44 {dimension_numbers = #tpu.dot_dimension_numbers<[1], [0], [0], [1], [0, 0, 1, 1], [], []>} : vector<8x128xf32>, vector<128x512xf32>, vector<8x512xf32> -> vector<8x512xf32>
    %133 = arith.addf %130, %132 : vector<8x512xf32>
    %134 = vector.extract_strided_slice %133 {offsets = [0, 0], sizes = [8, 384], strides = [1, 1]} : vector<8x512xf32> to vector<8x384xf32>
    %135 = arith.negf %134 : vector<8x384xf32>
    %136 = math.exp %135 : vector<8x384xf32>
    %cst_45 = arith.constant 1.000000e+00 : f32
    %137 = vector.broadcast %cst_45 : f32 to vector<8x384xf32>
    %138 = arith.addf %137, %136 : vector<8x384xf32>
    %139 = arith.divf %137, %138 : vector<8x384xf32>
    %140 = vector.extract_strided_slice %133 {offsets = [0, 384], sizes = [8, 128], strides = [1, 1]} : vector<8x512xf32> to vector<8x128xf32>
    %141 = math.tanh %140 : vector<8x128xf32>
    %142 = vector.extract_strided_slice %139 {offsets = [0, 128], sizes = [8, 128], strides = [1, 1]} : vector<8x384xf32> to vector<8x128xf32>
    %143 = arith.mulf %142, %126 : vector<8x128xf32>
    %144 = vector.extract_strided_slice %139 {offsets = [0, 0], sizes = [8, 128], strides = [1, 1]} : vector<8x384xf32> to vector<8x128xf32>
    %145 = arith.mulf %144, %141 : vector<8x128xf32>
    %146 = arith.addf %143, %145 : vector<8x128xf32>
    %147 = vector.extract_strided_slice %139 {offsets = [0, 256], sizes = [8, 128], strides = [1, 1]} : vector<8x384xf32> to vector<8x128xf32>
    %148 = math.tanh %146 : vector<8x128xf32>
    %149 = arith.mulf %147, %148 : vector<8x128xf32>
    %c56 = arith.constant 56 : index
    %c0_46 = arith.constant 0 : index
    %150 = vector.load %arg10[%c56, %c0_46] : memref<64x512xf32, #tpu.memory_space<vmem>>, vector<8x512xf32>
    %c0_47 = arith.constant 0 : index
    %c0_48 = arith.constant 0 : index
    %151 = vector.load %arg3[%c0_47, %c0_48] : memref<128x512xf32, #tpu.memory_space<vmem>>, vector<128x512xf32>
    %cst_49 = arith.constant dense<0.000000e+00> : vector<8x512xf32>
    %152 = tpu.matmul %149, %151, %cst_49 {dimension_numbers = #tpu.dot_dimension_numbers<[1], [0], [0], [1], [0, 0, 1, 1], [], []>} : vector<8x128xf32>, vector<128x512xf32>, vector<8x512xf32> -> vector<8x512xf32>
    %153 = arith.addf %150, %152 : vector<8x512xf32>
    %154 = vector.extract_strided_slice %153 {offsets = [0, 0], sizes = [8, 384], strides = [1, 1]} : vector<8x512xf32> to vector<8x384xf32>
    %155 = arith.negf %154 : vector<8x384xf32>
    %156 = math.exp %155 : vector<8x384xf32>
    %cst_50 = arith.constant 1.000000e+00 : f32
    %157 = vector.broadcast %cst_50 : f32 to vector<8x384xf32>
    %158 = arith.addf %157, %156 : vector<8x384xf32>
    %159 = arith.divf %157, %158 : vector<8x384xf32>
    %160 = vector.extract_strided_slice %153 {offsets = [0, 384], sizes = [8, 128], strides = [1, 1]} : vector<8x512xf32> to vector<8x128xf32>
    %161 = math.tanh %160 : vector<8x128xf32>
    %162 = vector.extract_strided_slice %159 {offsets = [0, 128], sizes = [8, 128], strides = [1, 1]} : vector<8x384xf32> to vector<8x128xf32>
    %163 = arith.mulf %162, %146 : vector<8x128xf32>
    %164 = vector.extract_strided_slice %159 {offsets = [0, 0], sizes = [8, 128], strides = [1, 1]} : vector<8x384xf32> to vector<8x128xf32>
    %165 = arith.mulf %164, %161 : vector<8x128xf32>
    %166 = arith.addf %163, %165 : vector<8x128xf32>
    %167 = vector.extract_strided_slice %159 {offsets = [0, 256], sizes = [8, 128], strides = [1, 1]} : vector<8x384xf32> to vector<8x128xf32>
    %168 = math.tanh %166 : vector<8x128xf32>
    %169 = arith.mulf %167, %168 : vector<8x128xf32>
    %c0_51 = arith.constant 0 : index
    %c0_52 = arith.constant 0 : index
    %170 = vector.load %arg5[%c0_51, %c0_52] : memref<128x128xf32, #tpu.memory_space<vmem>>, vector<128x128xf32>
    %cst_53 = arith.constant dense<0.000000e+00> : vector<8x128xf32>
    %171 = tpu.matmul %169, %170, %cst_53 {dimension_numbers = #tpu.dot_dimension_numbers<[1], [0], [0], [1], [0, 0, 1, 1], [], []>} : vector<8x128xf32>, vector<128x128xf32>, vector<8x128xf32> -> vector<8x128xf32>
    %c0_54 = arith.constant 0 : index
    %c0_55 = arith.constant 0 : index
    %172 = vector.load %arg6[%c0_54, %c0_55] : memref<1x128xf32, #tpu.memory_space<vmem>>, vector<1x128xf32>
    %173 = vector.broadcast %172 : vector<1x128xf32> to vector<8x128xf32>
    %174 = arith.addf %171, %173 : vector<8x128xf32>
    %175 = arith.negf %174 : vector<8x128xf32>
    %176 = math.exp %175 : vector<8x128xf32>
    %cst_56 = arith.constant 1.000000e+00 : f32
    %177 = vector.broadcast %cst_56 : f32 to vector<8x128xf32>
    %178 = arith.addf %177, %176 : vector<8x128xf32>
    %179 = arith.divf %177, %178 : vector<8x128xf32>
    %180 = arith.mulf %174, %179 : vector<8x128xf32>
    %c0_57 = arith.constant 0 : index
    %c0_58 = arith.constant 0 : index
    %181 = vector.load %arg7[%c0_57, %c0_58] : memref<128x128xf32, #tpu.memory_space<vmem>>, vector<128x128xf32>
    %cst_59 = arith.constant dense<0.000000e+00> : vector<8x128xf32>
    %182 = tpu.matmul %180, %181, %cst_59 {dimension_numbers = #tpu.dot_dimension_numbers<[1], [0], [0], [1], [0, 0, 1, 1], [], []>} : vector<8x128xf32>, vector<128x128xf32>, vector<8x128xf32> -> vector<8x128xf32>
    %c0_60 = arith.constant 0 : index
    %c0_61 = arith.constant 0 : index
    %183 = vector.load %arg8[%c0_60, %c0_61] : memref<1x128xf32, #tpu.memory_space<vmem>>, vector<1x128xf32>
    %184 = vector.broadcast %183 : vector<1x128xf32> to vector<8x128xf32>
    %185 = arith.addf %182, %184 : vector<8x128xf32>
    %c0_62 = arith.constant 0 : index
    %c0_63 = arith.constant 0 : index
    %186 = vector.load %arg9[%c0_62, %c0_63] : memref<8x128xf32, #tpu.memory_space<vmem>>, vector<8x128xf32>
    tpu.vector_store %arg9[%c0_62, %c0_63], %185 {strides = array<i32>} : memref<8x128xf32, #tpu.memory_space<vmem>>, vector<8x128xf32>,
    return
  }
  func.func @transform_0(%arg0: i32) -> (i32, i32, i32) {
    %c0_i32 = arith.constant 0 : i32
    %c0_i32_0 = arith.constant 0 : i32
    %c0_i32_1 = arith.constant 0 : i32
    return %arg0, %c0_i32, %c0_i32_0 : i32, i32, i32
  }
  func.func @transform_1(%arg0: i32) -> (i32, i32) {
    %c0_i32 = arith.constant 0 : i32
    %c0_i32_0 = arith.constant 0 : i32
    %c0_i32_1 = arith.constant 0 : i32
    return %c0_i32, %c0_i32_0 : i32, i32
  }
  func.func @transform_2(%arg0: i32) -> (i32, i32) {
    %c0_i32 = arith.constant 0 : i32
    %c0_i32_0 = arith.constant 0 : i32
    %c0_i32_1 = arith.constant 0 : i32
    return %c0_i32, %c0_i32_0 : i32, i32
  }
  func.func @transform_3(%arg0: i32) -> (i32, i32) {
    %c0_i32 = arith.constant 0 : i32
    %c0_i32_0 = arith.constant 0 : i32
    %c0_i32_1 = arith.constant 0 : i32
    return %c0_i32, %c0_i32_0 : i32, i32
  }
  func.func @transform_4(%arg0: i32) -> (i32, i32) {
    %c0_i32 = arith.constant 0 : i32
    %c0_i32_0 = arith.constant 0 : i32
    %c0_i32_1 = arith.constant 0 : i32
    return %c0_i32, %c0_i32_0 : i32, i32
  }
  func.func @transform_5(%arg0: i32) -> (i32, i32) {
    %c0_i32 = arith.constant 0 : i32
    %c0_i32_0 = arith.constant 0 : i32
    %c0_i32_1 = arith.constant 0 : i32
    return %c0_i32, %c0_i32_0 : i32, i32
  }
  func.func @transform_6(%arg0: i32) -> (i32, i32) {
    %c0_i32 = arith.constant 0 : i32
    %c0_i32_0 = arith.constant 0 : i32
    %c0_i32_1 = arith.constant 0 : i32
    return %c0_i32, %c0_i32_0 : i32, i32
  }
  func.func @transform_7(%arg0: i32) -> (i32, i32) {
    %c0_i32 = arith.constant 0 : i32
    %c0_i32_0 = arith.constant 0 : i32
    %c0_i32_1 = arith.constant 0 : i32
    return %c0_i32, %c0_i32_0 : i32, i32
  }
  func.func @transform_8(%arg0: i32) -> (i32, i32) {
    %c0_i32 = arith.constant 0 : i32
    %c0_i32_0 = arith.constant 0 : i32
    return %arg0, %c0_i32 : i32, i32
  }
}

</mosaic_0001>

<bundles_post_ra>
// kernel: tpu_custom_call.1
= control target key start
LH: loop header
LB: loop body
LE: loop exit
PB: predicated region body
PF: predicated region fallthrough
CT: control target
= control target key end

     0   :  { %13 = vsyncpa [#allocation4], 0  ;;  %s3148_s0 = inlined_call_operand.vmem [shape: f32[1,64,8], index: 0, kind: input, shape index: {}]   ;;  %s3149_s1 = inlined_call_operand.vmem [shape: f32[8,512], index: 1, kind: input, shape index: {}]   ;;  %s3150_s2 = inlined_call_operand.hbm [shape: f32[128,512], index: 2, kind: input, shape index: {}]   ;;  %s3151_s3 = inlined_call_operand.vmem [shape: f32[1,512], index: 3, kind: input, shape index: {}]   ;;  %s3152_s4 = inlined_call_operand.hbm [shape: f32[128,128], index: 4, kind: input, shape index: {}]   ;;  %s3153_s5 = inlined_call_operand.vmem [shape: f32[1,128], index: 5, kind: input, shape index: {}]   ;;  %s3154_s6 = inlined_call_operand.hbm [shape: f32[128,128], index: 6, kind: input, shape index: {}]   ;;  %s3155_s7 = inlined_call_operand.vmem [shape: f32[1,128], index: 7, kind: input, shape index: {}]   ;;  %s3156_s8 = inlined_call_operand.hbm [shape: f32[8,128], index: 8, kind: output, shape index: {}]  }
   0x1   :  { %14 = vsyncpa [#allocation7], 0  ;;  %s39_s29 = sshll.u32 %s3152_s4, 4  ;;  %s40_s29 = int_to_ptr.hbm [resolvable:$true] %s39_s29 }
   0x2   :  { %15 = vsyncpa [#allocation5], 0  ;;  %s2079_s30 = smov [#allocation6]   ;;  %s24_s12 = sshll.u32 %s3150_s2, 4  ;;  %s25_s12 = int_to_ptr.hbm [resolvable:$true] %s24_s12 }
   0x3   :  { %s41_s9 = sshll.u32 %s2079_s30, 4  ;;  %s2080_s13 = smov 128   ;;  %s42_s9 = int_to_ptr.vmem [resolvable:$true] %s41_s9 }
   0x4   :  { %s2081_s14 = smov 8   ;;  %s2082_s15 = smov [#allocation3]  }
   0x5   :  { %47 = dma.hbm_to_vmem [thread:$0]  %s40_s29, 2048, %s42_s9, [#allocation7], %s2080_s13, %s2080_s13, %s2081_s14  }
   0x6   :  { %s26_s16 = sshll.u32 %s2082_s15, 4  ;;  %s2083_s17 = smov 512   ;;  %s27_s16 = int_to_ptr.vmem [resolvable:$true] %s26_s16 }
   0x7   :  { %s2084_s18 = smov 32   ;;  %s54_s20 = sshll.u32 %s3154_s6, 4  ;;  %s55_s20 = int_to_ptr.hbm [resolvable:$true] %s54_s20 }
   0x8   :  { %32 = dma.hbm_to_vmem [thread:$0]  %s25_s12, 8192, %s27_s16, [#allocation4], %s2083_s17, %s2083_s17, %s2084_s18  }
   0x9   :  { %s2085_s21 = smov [#allocation8]  }
   0xa   :  { %s56_s22 = sshll.u32 %s2085_s21, 4  ;;  %s57_s22 = int_to_ptr.vmem [resolvable:$true] %s56_s22 }
   0xb   :  { %62 = dma.hbm_to_vmem [thread:$0]  %s55_s20, 2048, %s57_s22, [#allocation7], %s2080_s13, %s2080_s13, %s2081_s14  }
   0xc   :  { %2073 = dma.done.wait [#allocation4], 8192  }
   0xd   :  { %2074 = vsyncadd [#allocation4], 4294959104 }
   0xe   :  { %2075 = dma.done.wait [#allocation7], 4096  }
   0xf   :  { %2076 = vsyncadd [#allocation7], 4294963200  ;;  %v85_v0 = vld [vmem:[%s3149_s1] sm:$0xff]  ;;  %v86_v1 = vld [vmem:[%s3149_s1 + $0x8] sm:$0xff]  ;;  %vm99_vm0 = vcmask 64512   ;;  %s2087_s23 = smov [#allocation9]  }
  0x10   :  { %v2151_v2 = vld [vmem:[%s3148_s0] sm:$0xff]  ;;  %139 = vmatpush.msra.mxu0 %v85_v0  ;;  %1768 = vmatpush.msra.mxu2 %v85_v0  ;;  %v2156_v3 = vld [vmem:[%s3148_s0 + $0x30] sm:$0xff]  ;;  %v88_v5 = vld [vmem:[%s3149_s1 + $0x18] sm:$0xff]  ;;  %s1698_s24 = sshll.u32 %s2087_s23, 4  ;;  %s1700_s27 = sshll.u32 %s3156_s8, 4  ;;  %s1699_s24 = int_to_ptr.vmem [resolvable:$true] %s1698_s24  ;;  %s1701_s27 = int_to_ptr.hbm [resolvable:$true] %s1700_s27 }
  0x11   :  { %180 = vmatpush.msra.mxu1 %v86_v1  ;;  %1769 = vmatpush.msra.mxu3 %v86_v1  ;;  %v87_v4 = vld [vmem:[%s3149_s1 + $0x10] sm:$0xff]  ;;  %v2170_v7 = vld [vmem:[#allocation3 + $0x1e0] sm:$0xff]  ;;  %v2176_v8 = vld [vmem:[#allocation3 + $0x1e8] sm:$0xff] }
  0x12   :  { %1711 = vmatmul.msk.f32.vlgmr.msra.gmra.mxu0 %vm99_vm0, %v2151_v2  ;;  %1717 = vmatmul.msk.f32.vlgmr.msra.gmra.mxu2 %vm99_vm0, %v2156_v3  ;;  %v2168_v6 = vld [vmem:[#allocation3 + $0x1f0] sm:$0xff]  ;;  %v2178_v9 = vld [vmem:[#allocation3 + $0x1c0] sm:$0xff]  ;;  %v2184_v11 = vld [vmem:[#allocation3 + $0x1c8] sm:$0xff] }
  0x13   :  { %1719 = vmatmul.msk.f32.vlgmr.msra.gmra.mxu1 %vm99_vm0, %v2151_v2  ;;  %1725 = vmatmul.msk.f32.vlgmr.msra.gmra.mxu3 %vm99_vm0, %v2156_v3  ;;  %v2180_v10 = vld [vmem:[#allocation3 + $0x1d0] sm:$0xff]  ;;  %v2187_v12 = vld [vmem:[#allocation3 + $0x1a0] sm:$0xff]  ;;  %v2191_v14 = vld [vmem:[#allocation3 + $0x1f8] sm:$0xff] }
  0x14   :  { %221 = vmatpush.msrb.mxu2 %v87_v4  ;;  %262 = vmatpush.msrb.mxu3 %v88_v5  ;;  %v2189_v13 = vld [vmem:[#allocation3 + $0x1b0] sm:$0xff]  ;;  %v2196_v15 = vld [vmem:[%s3148_s0 + $0x8] sm:$0xff]  ;;  %v2201_v16 = vld [vmem:[%s3148_s0 + $0x38] sm:$0xff] }
  0x15   :  { %388 = vmatpush.msrb.mxu0 %v2170_v7  ;;  %408 = vmatpush.msrb.mxu1 %v2176_v8  ;;  %v2208_v17 = vld [vmem:[#allocation3 + $0x1a8] sm:$0xff]  ;;  %v2210_v18 = vld [vmem:[#allocation3 + $0x180] sm:$0xff]  ;;  %v2217_v19 = vld [vmem:[#allocation3 + $0x190] sm:$0xff] }
  0x16   :  { %428 = vmatpush.msra.mxu2 %v2168_v6  ;;  %448 = vmatpush.msra.mxu3 %v2191_v14  ;;  %v2219_v20 = vld [vmem:[#allocation3 + $0x1d8] sm:$0xff]  ;;  %v2225_v21 = vld [vmem:[#allocation3 + $0x188] sm:$0xff]  ;;  %v2227_v22 = vld [vmem:[#allocation3 + $0x160] sm:$0xff] }
  0x17   :  { %389 = vmatpush.msrb.mxu0 %v2178_v9  ;;  %409 = vmatpush.msrb.mxu1 %v2184_v11  ;;  %v2231_v23 = vld [vmem:[#allocation3 + $0x170] sm:$0xff]  ;;  %v2233_v24 = vld [vmem:[#allocation3 + $0x1b8] sm:$0xff]  ;;  %v2235_v25 = vld [vmem:[#allocation3 + $0x168] sm:$0xff] }
  0x18   :  { %429 = vmatpush.msra.mxu2 %v2180_v10  ;;  %v2237_v26 = vld [vmem:[#allocation3 + $0x140] sm:$0xff]  ;;  %449 = vmatpush.msra.mxu3 %v2219_v20  ;;  %v2243_v27 = vld [vmem:[#allocation3 + $0x150] sm:$0xff]  ;;  %v2245_v28 = vld [vmem:[#allocation3 + $0x198] sm:$0xff] }
  0x19   :  { %390 = vmatpush.msrb.mxu0 %v2187_v12  ;;  %410 = vmatpush.msrb.mxu1 %v2208_v17  ;;  %v2250_v29 = vld [vmem:[%s3148_s0 + $0x10] sm:$0xff]  ;;  %v2256_v30 = vld [vmem:[#allocation3 + $0x148] sm:$0xff]  ;;  %v2258_v31 = vld [vmem:[#allocation3 + $0x120] sm:$0xff] }
  0x1a   :  { %430 = vmatpush.msra.mxu2 %v2189_v13  ;;  %1712 = vmatmul.msk.f32.gmra.mxu0 %vm99_vm0, %v2196_v15  ;;  %v2262_v32 = vld [vmem:[#allocation3 + $0x130] sm:$0xff]  ;;  %v2268_v33 = vld [vmem:[#allocation3 + $0x178] sm:$0xff]  ;;  %v2274_v34 = vld [vmem:[#allocation3 + $0x128] sm:$0xff] }
  0x1b   :  { %1718 = vmatmul.msk.f32.gmra.mxu2 %vm99_vm0, %v2201_v16  ;;  %1720 = vmatmul.msk.f32.gmra.mxu1 %vm99_vm0, %v2196_v15  ;;  %v2276_v35 = vld [vmem:[#allocation3 + $0x100] sm:$0xff]  ;;  %v2280_v36 = vld [vmem:[#allocation3 + $0x110] sm:$0xff]  ;;  %v2282_v37 = vld [vmem:[#allocation3 + $0x158] sm:$0xff] }
  0x1c   :  { %1726 = vmatmul.msk.f32.gmra.mxu3 %vm99_vm0, %v2201_v16  ;;  %391 = vmatpush.msrb.mxu0 %v2210_v18  ;;  %v2284_v38 = vld [vmem:[#allocation3 + $0x108] sm:$0xff]  ;;  %v2286_v39 = vld [vmem:[#allocation3 + $0xe0] sm:$0xff]  ;;  %v2292_v40 = vld [vmem:[#allocation3 + $0xf0] sm:$0xff] }
  0x1d   :  { %431 = vmatpush.msra.mxu2 %v2217_v19  ;;  %411 = vmatpush.msrb.mxu1 %v2225_v21  ;;  %v2294_v41 = vld [vmem:[#allocation3 + $0x138] sm:$0xff]  ;;  %v2305_v43 = vld [vmem:[#allocation3 + $0xe8] sm:$0xff]  ;;  %v2307_v44 = vld [vmem:[#allocation3 + $0xc0] sm:$0xff] }
  0x1e   :  { %392 = vmatpush.msrb.mxu0 %v2227_v22  ;;  %450 = vmatpush.msra.mxu3 %v2233_v24  ;;  %v2299_v42 = vld [vmem:[%s3148_s0 + $0x18] sm:$0xff]  ;;  %v2315_v45 = vld [vmem:[#allocation3 + $0xd0] sm:$0xff]  ;;  %v2323_v47 = vld [vmem:[#allocation3 + $0xc8] sm:$0xff] }
  0x1f   :  { %432 = vmatpush.msra.mxu2 %v2231_v23  ;;  %412 = vmatpush.msrb.mxu1 %v2235_v25  ;;  %v2317_v46 = vld [vmem:[#allocation3 + $0x118] sm:$0xff]  ;;  %v2325_v48 = vld [vmem:[#allocation3 + $0xa0] sm:$0xff]  ;;  %v2329_v49 = vld [vmem:[#allocation3 + $0xb0] sm:$0xff] }
  0x20   :  { %393 = vmatpush.msrb.mxu0 %v2237_v26  ;;  %451 = vmatpush.msra.mxu3 %v2245_v28  ;;  %3254 = vst [vmem:[#allocation13_spill] sm:$0xff] %v2325_v48  ;;  %v2331_v50 = vld [vmem:[#allocation3 + $0xf8] sm:$0xff]  ;;  %v2333_v51 = vld [vmem:[#allocation3 + $0xa8] sm:$0xff]  ;;  %v2335_v52 = vld [vmem:[#allocation3 + $0x80] sm:$0xff] }
  0x21   :  { %433 = vmatpush.msra.mxu2 %v2243_v27  ;;  %413 = vmatpush.msrb.mxu1 %v2256_v30  ;;  %3255 = vst [vmem:[#allocation14_spill] sm:$0xff] %v2329_v49  ;;  %v2341_v53 = vld [vmem:[#allocation3 + $0x90] sm:$0xff]  ;;  %v2343_v54 = vld [vmem:[#allocation3 + $0xd8] sm:$0xff]  ;;  %v81_v55 = vld [vmem:[%s3148_s0 + $0x20] sm:$0xff] }
  0x22   :  { %1713 = vmatmul.msk.f32.gmra.mxu0 %vm99_vm0, %v2250_v29  ;;  %452 = vmatpush.msra.mxu3 %v2268_v33  ;;  %3256 = vst [vmem:[#allocation15_spill] sm:$0xff] %v2333_v51  ;;  %v2352_v56 = vld [vmem:[#allocation3 + $0x88] sm:$0xff]  ;;  %v2354_v57 = vld [vmem:[#allocation3 + $0x60] sm:$0xff]  ;;  %v2368_v60 = vld [vmem:[#allocation3 + $0x70] sm:$0xff] }
  0x23   :  { %1727 = vmatmul.msk.f32.vlgmr.msrb.gmra.mxu2 %vm99_vm0, %v2151_v2  ;;  %1721 = vmatmul.msk.f32.gmra.mxu1 %vm99_vm0, %v2250_v29  ;;  %3257 = vst [vmem:[#allocation16_spill] sm:$0xff] %v2335_v52  ;;  %v2361_v58 = vld [vmem:[#allocation3 + $0x68] sm:$0xff]  ;;  %v2366_v59 = vld [vmem:[#allocation3 + $0x40] sm:$0xff]  ;;  %v2370_v61 = vld [vmem:[#allocation3 + $0xb8] sm:$0xff] }
  0x24   :  { %1735 = vmatmul.msk.f32.vlgmr.msrb.gmra.mxu3 %vm99_vm0, %v2151_v2  ;;  %394 = vmatpush.msrb.mxu0 %v2258_v31  ;;  %3258 = vst [vmem:[#allocation17_spill] sm:$0xff] %v2341_v53  ;;  %v2374_v62 = vld [vmem:[#allocation3 + $0x50] sm:$0xff]  ;;  %v2376_v63 = vld [vmem:[#allocation3 + $0x98] sm:$0xff]  ;;  %v2378_v0 = vld [vmem:[#allocation3 + $0x48] sm:$0xff] }
  0x25   :  { %434 = vmatpush.msra.mxu2 %v2262_v32  ;;  %414 = vmatpush.msrb.mxu1 %v2274_v34  ;;  %3259 = vst [vmem:[#allocation18_spill] sm:$0xff] %v2343_v54  ;;  %v2380_v1 = vld [vmem:[#allocation3 + $0x20] sm:$0xff]  ;;  %v82_v2 = vld [vmem:[%s3148_s0 + $0x28] sm:$0xff] }
  0x26   :  { %395 = vmatpush.msrb.mxu0 %v2276_v35  ;;  %453 = vmatpush.msra.mxu3 %v2282_v37  ;;  %3260 = vst [vmem:[#allocation19_spill] sm:$0xff] %v2352_v56  ;;  %v2393_v4 = vld [vmem:[#allocation3 + $0x28] sm:$0xff]  ;;  %v2395_v5 = vld [vmem:[#allocation3] sm:$0xff] }
  0x27   :  { %435 = vmatpush.msra.mxu2 %v2280_v36  ;;  %415 = vmatpush.msrb.mxu1 %v2284_v38  ;;  %3261 = vst [vmem:[#allocation20_spill] sm:$0xff] %v2354_v57 }
  0x28   :  { %396 = vmatpush.msrb.mxu0 %v2286_v39  ;;  %454 = vmatpush.msra.mxu3 %v2294_v41  ;;  %3262 = vst [vmem:[#allocation21_spill] sm:$0xff] %v2361_v58 }
  0x29   :  { %436 = vmatpush.msra.mxu2 %v2292_v40  ;;  %416 = vmatpush.msrb.mxu1 %v2305_v43  ;;  %3263 = vst [vmem:[#allocation22_spill] sm:$0xff] %v2366_v59 }
  0x2a   :  { %1714 = vmatmul.msk.f32.gmra.mxu0 %vm99_vm0, %v2299_v42  ;;  %455 = vmatpush.msra.mxu3 %v2317_v46  ;;  %3264 = vst [vmem:[#allocation23_spill] sm:$0xff] %v2368_v60 }
  0x2b   :  { %1728 = vmatmul.msk.f32.gmra.mxu2 %vm99_vm0, %v2196_v15  ;;  %1722 = vmatmul.msk.f32.gmra.mxu1 %vm99_vm0, %v2299_v42  ;;  %3265 = vst [vmem:[#allocation24_spill] sm:$0xff] %v2370_v61 }
  0x2c   :  { %1736 = vmatmul.msk.f32.gmra.mxu3 %vm99_vm0, %v2196_v15  ;;  %397 = vmatpush.msrb.mxu0 %v2307_v44  ;;  %3266 = vst [vmem:[#allocation25_spill] sm:$0xff] %v2374_v62  ;;  %v2403_v15 = vld [vmem:[#allocation3 + $0x8] sm:$0xff] }
  0x2d   :  { %437 = vmatpush.msra.mxu2 %v2315_v45  ;;  %417 = vmatpush.msrb.mxu1 %v2323_v47  ;;  %3267 = vst [vmem:[#allocation26_spill] sm:$0xff] %v2376_v63 }
  0x2e   :  { %398 = vmatpush.msrb.mxu0 %v2325_v48  ;;  %456 = vmatpush.msra.mxu3 %v2331_v50  ;;  %3268 = vst [vmem:[#allocation27_spill] sm:$0xff] %v2378_v0 }
  0x2f   :  { %438 = vmatpush.msra.mxu2 %v2329_v49  ;;  %418 = vmatpush.msrb.mxu1 %v2333_v51  ;;  %3269 = vst [vmem:[#allocation28_spill] sm:$0xff] %v2380_v1 }
  0x30   :  { %399 = vmatpush.msrb.mxu0 %v2335_v52  ;;  %457 = vmatpush.msra.mxu3 %v2343_v54  ;;  %3270 = vst [vmem:[#allocation29_spill] sm:$0xff] %v2393_v4 }
  0x31   :  { %439 = vmatpush.msra.mxu2 %v2341_v53  ;;  %419 = vmatpush.msrb.mxu1 %v2352_v56  ;;  %3271 = vst [vmem:[#allocation30_spill] sm:$0xff] %v2395_v5 }
  0x32   :  { %1715 = vmatmul.msk.f32.gmra.mxu0 %vm99_vm0, %v81_v55  ;;  %458 = vmatpush.msra.mxu3 %v2370_v61  ;;  %3272 = vst [vmem:[#allocation31_spill] sm:$0xff] %v2403_v15 }
  0x33   :  { %1729 = vmatmul.msk.f32.gmra.mxu2 %vm99_vm0, %v2250_v29  ;;  %1723 = vmatmul.msk.f32.gmra.mxu1 %vm99_vm0, %v81_v55 }
  0x34   :  { %1737 = vmatmul.msk.f32.gmra.mxu3 %vm99_vm0, %v2250_v29  ;;  %400 = vmatpush.msrb.mxu0 %v2354_v57  ;;  %v2405_v29 = vld [vmem:[#allocation3 + $0x30] sm:$0xff] }
  0x35   :  { %440 = vmatpush.msra.mxu2 %v2368_v60  ;;  %420 = vmatpush.msrb.mxu1 %v2361_v58  ;;  %3273 = vst [vmem:[#allocation32_spill] sm:$0xff] %v2405_v29 }
  0x36   :  { %401 = vmatpush.msrb.mxu0 %v2366_v59  ;;  %459 = vmatpush.msra.mxu3 %v2376_v63 }
  0x37   :  { %441 = vmatpush.msra.mxu2 %v2374_v62  ;;  %421 = vmatpush.msrb.mxu1 %v2378_v0  ;;  %v2407_v62 = vld [vmem:[#allocation3 + $0x78] sm:$0xff]  ;;  %v2413_v0 = vld [vmem:[#allocation3 + $0x10] sm:$0xff] }
  0x38   :  { %402 = vmatpush.msrb.mxu0 %v2380_v1  ;;  %3274 = vst [vmem:[#allocation33_spill] sm:$0xff] %v2407_v62  ;;  %v2411_v1 = vld [vmem:[#allocation3 + $0x58] sm:$0xff]  ;;  %460 = vmatpush.msra.mxu3 %v2407_v62 }
  0x39   :  { %422 = vmatpush.msrb.mxu1 %v2393_v4  ;;  %3275 = vst [vmem:[#allocation34_spill] sm:$0xff] %v2411_v1  ;;  %442 = vmatpush.msra.mxu2 %v2405_v29 }
  0x3a   :  { %1716 = vmatmul.msk.f32.gmra.mxu0 %vm99_vm0, %v82_v2  ;;  %3276 = vst [vmem:[#allocation35_spill] sm:$0xff] %v2413_v0  ;;  %461 = vmatpush.msra.mxu3 %v2411_v1 }
  0x3b   :  { %1730 = vmatmul.msk.f32.gmra.mxu2 %vm99_vm0, %v2299_v42  ;;  %1724 = vmatmul.msk.f32.gmra.mxu1 %vm99_vm0, %v82_v2 }
  0x3c   :  { %1738 = vmatmul.msk.f32.gmra.mxu3 %vm99_vm0, %v2299_v42  ;;  %403 = vmatpush.msrb.mxu0 %v2395_v5  ;;  %v2418_v42 = vld [vmem:[#allocation3 + $0x38] sm:$0xff] }
  0x3d   :  { %423 = vmatpush.msrb.mxu1 %v2403_v15  ;;  %3277 = vst [vmem:[#allocation36_spill] sm:$0xff] %v2418_v42  ;;  %443 = vmatpush.msra.mxu2 %v2413_v0  ;;  %v2426_v5 = vld [vmem:[#allocation3 + $0x18] sm:$0xff]  ;;  %v2086_v15 = vmov 0.0  }
  0x3e   :  { %539 = vmatpush.msra.mxu0 %v2170_v7  ;;  %462 = vmatpush.msra.mxu3 %v2418_v42  ;;  %3278 = vst [vmem:[#allocation37_spill] sm:$0xff] %v2426_v5 }
  0x3f   :  { %559 = vmatpush.msra.mxu1 %v2176_v8  ;;  %579 = vmatpush.msrb.mxu2 %v2168_v6 }
  0x40   :  { %540 = vmatpush.msra.mxu0 %v2178_v9  ;;  %463 = vmatpush.msra.mxu3 %v2426_v5 }
  0x41   :  { %560 = vmatpush.msra.mxu1 %v2184_v11  ;;  %580 = vmatpush.msrb.mxu2 %v2180_v10 }
  0x42   :  { %404 = vmatmul.f32.vlgmr.msrb.gmra.mxu0 %v2086_v15  ;;  %599 = vmatpush.msrb.mxu3 %v2191_v14 }
  0x43   :  { %1731 = vmatmul.msk.f32.gmra.mxu2 %vm99_vm0, %v81_v55  ;;  %424 = vmatmul.f32.vlgmr.msrb.gmra.mxu1 %v2086_v15 }
  0x44   :  { %1739 = vmatmul.msk.f32.gmra.mxu3 %vm99_vm0, %v81_v55  ;;  %541 = vmatpush.msra.mxu0 %v2187_v12  ;;  %v3281_v55 = vld [vmem:[#allocation28_spill] sm:$0xff] }
  0x45   :  { %561 = vmatpush.msra.mxu1 %v2208_v17  ;;  %600 = vmatpush.msrb.mxu3 %v2219_v20 }
  0x46   :  { %581 = vmatpush.msrb.mxu2 %v2189_v13  ;;  %542 = vmatpush.msra.mxu0 %v2210_v18 }
  0x47   :  { %562 = vmatpush.msra.mxu1 %v2225_v21  ;;  %601 = vmatpush.msrb.mxu3 %v2233_v24 }
  0x48   :  { %582 = vmatpush.msrb.mxu2 %v2217_v19  ;;  %543 = vmatpush.msra.mxu0 %v2227_v22 }
  0x49   :  { %563 = vmatpush.msra.mxu1 %v2235_v25  ;;  %602 = vmatpush.msrb.mxu3 %v2245_v28 }
  0x4a   :  { %583 = vmatpush.msrb.mxu2 %v2231_v23  ;;  %544 = vmatpush.msra.mxu0 %v2237_v26 }
  0x4b   :  { %1732 = vmatmul.msk.f32.gmra.mxu2 %vm99_vm0, %v82_v2  ;;  %564 = vmatpush.msra.mxu1 %v2256_v30 }
  0x4c   :  { %1740 = vmatmul.msk.f32.gmra.mxu3 %vm99_vm0, %v82_v2  ;;  %584 = vmatpush.msrb.mxu2 %v2243_v27  ;;  %v3282_v2 = vld [vmem:[#allocation30_spill] sm:$0xff] }
  0x4d   :  { %603 = vmatpush.msrb.mxu3 %v2268_v33  ;;  %545 = vmatpush.msra.mxu0 %v2258_v31 }
  0x4e   :  { %565 = vmatpush.msra.mxu1 %v2274_v34  ;;  %585 = vmatpush.msrb.mxu2 %v2262_v32 }
  0x4f   :  { %604 = vmatpush.msrb.mxu3 %v2282_v37  ;;  %546 = vmatpush.msra.mxu0 %v2276_v35 }
  0x50   :  { %566 = vmatpush.msra.mxu1 %v2284_v38  ;;  %586 = vmatpush.msrb.mxu2 %v2280_v36 }
  0x51   :  { %605 = vmatpush.msrb.mxu3 %v2294_v41  ;;  %547 = vmatpush.msra.mxu0 %v2286_v39 }
  0x52   :  { %567 = vmatpush.msra.mxu1 %v2305_v43  ;;  %587 = vmatpush.msrb.mxu2 %v2292_v40 }
  0x53   :  { %1733 = vmatmul.msk.f32.gmra.mxu2 %vm99_vm0, %v2156_v3  ;;  %606 = vmatpush.msrb.mxu3 %v2317_v46 }
  0x54   :  { %1741 = vmatmul.msk.f32.gmra.mxu3 %vm99_vm0, %v2156_v3  ;;  %548 = vmatpush.msra.mxu0 %v2307_v44  ;;  %v3279_v3 = vld [vmem:[#allocation27_spill] sm:$0xff] }
  0x55   :  { %607 = vmatpush.msrb.mxu3 %v2331_v50  ;;  %568 = vmatpush.msra.mxu1 %v2323_v47 }
  0x56   :  { %588 = vmatpush.msrb.mxu2 %v2315_v45  ;;  %549 = vmatpush.msra.mxu0 %v2325_v48 }
  0x57   :  { %608 = vmatpush.msrb.mxu3 %v2343_v54  ;;  %569 = vmatpush.msra.mxu1 %v2333_v51 }
  0x58   :  { %589 = vmatpush.msrb.mxu2 %v2329_v49  ;;  %550 = vmatpush.msra.mxu0 %v2335_v52 }
  0x59   :  { %609 = vmatpush.msrb.mxu3 %v2370_v61  ;;  %570 = vmatpush.msra.mxu1 %v2352_v56 }
  0x5a   :  { %590 = vmatpush.msrb.mxu2 %v2341_v53  ;;  %551 = vmatpush.msra.mxu0 %v2354_v57 }
  0x5b   :  { %1734 = vmatmul.msk.f32.gmra.mxu2 %vm99_vm0, %v2201_v16  ;;  %610 = vmatpush.msrb.mxu3 %v2376_v63 }
  0x5c   :  { %1742 = vmatmul.msk.f32.gmra.mxu3 %vm99_vm0, %v2201_v16  ;;  %571 = vmatpush.msra.mxu1 %v2361_v58  ;;  %v3280_v16 = vld [vmem:[#allocation25_spill] sm:$0xff] }
  0x5d   :  { %591 = vmatpush.msrb.mxu2 %v2368_v60  ;;  %611 = vmatpush.msrb.mxu3 %v2407_v62 }
  0x5e   :  { %552 = vmatpush.msra.mxu0 %v2366_v59  ;;  %572 = vmatpush.msra.mxu1 %v3279_v3  ;;  %v3283_v59 = vld [vmem:[#allocation31_spill] sm:$0xff] }
  0x5f   :  { %592 = vmatpush.msrb.mxu2 %v3280_v16  ;;  %612 = vmatpush.msrb.mxu3 %v2411_v1 }
  0x60   :  { %553 = vmatpush.msra.mxu0 %v3281_v55  ;;  %573 = vmatpush.msra.mxu1 %v2393_v4 }
  0x61   :  { %593 = vmatpush.msrb.mxu2 %v2405_v29  ;;  %613 = vmatpush.msrb.mxu3 %v2418_v42 }
  0x62   :  { %554 = vmatpush.msra.mxu0 %v3282_v2  ;;  %574 = vmatpush.msra.mxu1 %v3283_v59 }
  0x63   :  { %444 = vmatmul.f32.vlgmr.msra.gmra.mxu2 %v2086_v15  ;;  %614 = vmatpush.msrb.mxu3 %v2426_v5 }
  0x64   :  { %464 = vmatmul.f32.vlgmr.msra.gmra.mxu3 %v2086_v15  ;;  %594 = vmatpush.msrb.mxu2 %v2413_v0  ;;  %v3284_v15 = vld [vmem:[#allocation22_spill] sm:$0xff] }
  0x65   :  { %690 = vmatpush.msrb.mxu0 %v2170_v7  ;;  %710 = vmatpush.msrb.mxu1 %v2176_v8 }
  0x66   :  { %730 = vmatpush.msra.mxu2 %v2168_v6  ;;  %750 = vmatpush.msra.mxu3 %v2191_v14 }
  0x67   :  { %691 = vmatpush.msrb.mxu0 %v2178_v9  ;;  %711 = vmatpush.msrb.mxu1 %v2184_v11 }
  0x68   :  { %731 = vmatpush.msra.mxu2 %v2180_v10  ;;  %751 = vmatpush.msra.mxu3 %v2219_v20 }
  0x69   :  { %692 = vmatpush.msrb.mxu0 %v2187_v12  ;;  %712 = vmatpush.msrb.mxu1 %v2208_v17 }
  0x6a   :  { %732 = vmatpush.msra.mxu2 %v2189_v13  ;;  %752 = vmatpush.msra.mxu3 %v2233_v24 }
  0x6b   :  { %693 = vmatpush.msrb.mxu0 %v2210_v18  ;;  %713 = vmatpush.msrb.mxu1 %v2225_v21 }
  0x6c   :  { %733 = vmatpush.msra.mxu2 %v2217_v19  ;;  %753 = vmatpush.msra.mxu3 %v2245_v28 }
  0x6d   :  { %694 = vmatpush.msrb.mxu0 %v2227_v22  ;;  %714 = vmatpush.msrb.mxu1 %v2235_v25 }
  0x6e   :  { %734 = vmatpush.msra.mxu2 %v2231_v23  ;;  %754 = vmatpush.msra.mxu3 %v2268_v33 }
  0x6f   :  { %695 = vmatpush.msrb.mxu0 %v2237_v26  ;;  %715 = vmatpush.msrb.mxu1 %v2256_v30 }
  0x70   :  { %735 = vmatpush.msra.mxu2 %v2243_v27  ;;  %755 = vmatpush.msra.mxu3 %v2282_v37 }
  0x71   :  { %696 = vmatpush.msrb.mxu0 %v2258_v31  ;;  %716 = vmatpush.msrb.mxu1 %v2274_v34 }
  0x72   :  { %736 = vmatpush.msra.mxu2 %v2262_v32  ;;  %756 = vmatpush.msra.mxu3 %v2294_v41 }
  0x73   :  { %697 = vmatpush.msrb.mxu0 %v2276_v35  ;;  %717 = vmatpush.msrb.mxu1 %v2284_v38 }
  0x74   :  { %737 = vmatpush.msra.mxu2 %v2280_v36  ;;  %757 = vmatpush.msra.mxu3 %v2317_v46 }
  0x75   :  { %698 = vmatpush.msrb.mxu0 %v2286_v39  ;;  %718 = vmatpush.msrb.mxu1 %v2305_v43 }
  0x76   :  { %738 = vmatpush.msra.mxu2 %v2292_v40  ;;  %758 = vmatpush.msra.mxu3 %v2331_v50 }
  0x77   :  { %699 = vmatpush.msrb.mxu0 %v2307_v44  ;;  %719 = vmatpush.msrb.mxu1 %v2323_v47 }
  0x78   :  { %739 = vmatpush.msra.mxu2 %v2315_v45  ;;  %759 = vmatpush.msra.mxu3 %v2343_v54 }
  0x79   :  { %700 = vmatpush.msrb.mxu0 %v2325_v48  ;;  %720 = vmatpush.msrb.mxu1 %v2333_v51 }
  0x7a   :  { %740 = vmatpush.msra.mxu2 %v2329_v49  ;;  %760 = vmatpush.msra.mxu3 %v2370_v61 }
  0x7b   :  { %701 = vmatpush.msrb.mxu0 %v2335_v52  ;;  %721 = vmatpush.msrb.mxu1 %v2352_v56 }
  0x7c   :  { %741 = vmatpush.msra.mxu2 %v2341_v53  ;;  %761 = vmatpush.msra.mxu3 %v2376_v63 }
  0x7d   :  { %702 = vmatpush.msrb.mxu0 %v2354_v57  ;;  %722 = vmatpush.msrb.mxu1 %v2361_v58 }
  0x7e   :  { %742 = vmatpush.msra.mxu2 %v2368_v60  ;;  %762 = vmatpush.msra.mxu3 %v2407_v62 }
  0x7f   :  { %703 = vmatpush.msrb.mxu0 %v3284_v15  ;;  %723 = vmatpush.msrb.mxu1 %v3279_v3 }
  0x80   :  { %743 = vmatpush.msra.mxu2 %v3280_v16  ;;  %763 = vmatpush.msra.mxu3 %v2411_v1  ;;  %v89_v1 = vld [vmem:[%s3151_s3] sm:$0xf] }
  0x81   :  { %704 = vmatpush.msrb.mxu0 %v3281_v55  ;;  %724 = vmatpush.msrb.mxu1 %v2393_v4  ;;  %v91_v3 = vperm.slane %v89_v1, 0  ;;  %v92_v4 = vperm.slane %v89_v1, 1 }
  0x82   :  { %744 = vmatpush.msra.mxu2 %v2405_v29  ;;  %764 = vmatpush.msra.mxu3 %v2418_v42 }
  0x83   :  { %705 = vmatpush.msrb.mxu0 %v3282_v2  ;;  %725 = vmatpush.msrb.mxu1 %v3283_v59 }
  0x84   :  { %745 = vmatpush.msra.mxu2 %v2413_v0  ;;  %765 = vmatpush.msra.mxu3 %v2426_v5 }
  0x8f   :  { %v141_v16 = vpop.f32.mrf.mxu0 }
  0x90   :  { %v182_v55 = vpop.f32.mrf.mxu1 }
  0x95   :  { %v159_v15 = vpop.f32.mrf.mxu2 }
  0x96   :  { %v2573_v29 = vadd.f32 %v159_v15, %v91_v3  ;;  %v200_v42 = vpop.f32.mrf.mxu3 }
  0x97   :  { %v2575_v62 = vadd.f32 %v200_v42, %v92_v4  ;;  %v144_v2 = vpop.f32.mrf.mxu0 }
  0x98   :  { %3285 = vst [vmem:[#allocation38_spill] sm:$0xff] %v2573_v29  ;;  %v2577_v59 = vadd.f32 %v144_v2, %v91_v3  ;;  %v185_v0 = vpop.f32.mrf.mxu1 }
  0x99   :  { %3286 = vst [vmem:[#allocation39_spill] sm:$0xff] %v2575_v62  ;;  %v2579_v60 = vadd.f32 %v185_v0, %v92_v4 }
  0x9a   :  { %3287 = vst [vmem:[#allocation40_spill] sm:$0xff] %v2577_v59 }
  0x9b   :  { %3288 = vst [vmem:[#allocation41_spill] sm:$0xff] %v2579_v60 }
  0x9e   :  { %v162_v5 = vpop.f32.mrf.mxu2 }
  0x9f   :  { %v2581_v58 = vadd.f32 %v162_v5, %v91_v3  ;;  %v203_v57 = vpop.f32.mrf.mxu3  ;;  %v147_v53 = vpop.f32.mrf.mxu0  ;;  %v93_v5 = vperm.slane %v89_v1, 2 }
  0xa0   :  { %v2583_v63 = vadd.f32 %v203_v57, %v92_v4  ;;  %v2585_v56 = vadd.f32 %v147_v53, %v91_v3  ;;  %v188_v15 = vpop.f32.mrf.mxu1 }
  0xa1   :  { %3289 = vst [vmem:[#allocation42_spill] sm:$0xff] %v2581_v58  ;;  %v2587_v29 = vadd.f32 %v188_v15, %v92_v4  ;;  %v94_v58 = vperm.slane %v89_v1, 3 }
  0xa2   :  { %3290 = vst [vmem:[#allocation43_spill] sm:$0xff] %v2583_v63 }
  0xa3   :  { %3291 = vst [vmem:[#allocation44_spill] sm:$0xff] %v2585_v56 }
  0xa4   :  { %3292 = vst [vmem:[#allocation45_spill] sm:$0xff] %v2587_v29 }
  0xa6   :  { %v2589_v42 = vpop.f32.mrf.mxu2 }
  0xa7   :  { %v2591_v62 = vpop.f32.mrf.mxu3  ;;  %v150_v2 = vpop.f32.mrf.mxu0 }
  0xa8   :  { %v2593_v59 = vadd.f32 %v150_v2, %v91_v3  ;;  %v191_v0 = vpop.f32.mrf.mxu1 }
  0xa9   :  { %v2595_v60 = vadd.f32 %v191_v0, %v92_v4 }
  0xaa   :  { %3293 = vst [vmem:[#allocation46_spill] sm:$0xff] %v2593_v59 }
  0xab   :  { %3294 = vst [vmem:[#allocation47_spill] sm:$0xff] %v2595_v60 }
  0xae   :  { %v226_v57 = vpop.f32.mrf.mxu2 }
  0xaf   :  { %v2597_v63 = vadd.f32 %v226_v57, %v93_v5  ;;  %v267_v53 = vpop.f32.mrf.mxu3  ;;  %v153_v15 = vpop.f32.mrf.mxu0 }
  0xb0   :  { %v2599_v56 = vadd.f32 %v267_v53, %v94_v58  ;;  %v2601_v29 = vadd.f32 %v153_v15, %v91_v3  ;;  %v194_v52 = vpop.f32.mrf.mxu1 }
  0xb1   :  { %3295 = vst [vmem:[#allocation48_spill] sm:$0xff] %v2597_v63  ;;  %v2603_v61 = vadd.f32 %v194_v52, %v92_v4 }
  0xb2   :  { %3296 = vst [vmem:[#allocation49_spill] sm:$0xff] %v2599_v56 }
  0xb3   :  { %3297 = vst [vmem:[#allocation50_spill] sm:$0xff] %v2601_v29 }
  0xb4   :  { %3298 = vst [vmem:[#allocation51_spill] sm:$0xff] %v2603_v61  ;;  %v142_v61 = vadd.f32 %v141_v16, %v91_v3 }
  0xb6   :  { %v229_v49 = vpop.f32.mrf.mxu2 }
  0xb7   :  { %v2605_v2 = vadd.f32 %v229_v49, %v93_v5  ;;  %v270_v59 = vpop.f32.mrf.mxu3  ;;  %v156_v60 = vpop.f32.mrf.mxu0  ;;  %v183_v49 = vadd.f32 %v182_v55, %v92_v4 }
  0xb8   :  { %v2607_v0 = vadd.f32 %v270_v59, %v94_v58  ;;  %v2609_v1 = vadd.f32 %v156_v60, %v91_v3  ;;  %v197_v57 = vpop.f32.mrf.mxu1 }
  0xb9   :  { %3299 = vst [vmem:[#allocation52_spill] sm:$0xff] %v2605_v2  ;;  %v2611_v63 = vadd.f32 %v197_v57, %v92_v4 }
  0xba   :  { %3300 = vst [vmem:[#allocation53_spill] sm:$0xff] %v2607_v0 }
  0xbb   :  { %3301 = vst [vmem:[#allocation54_spill] sm:$0xff] %v2609_v1 }
  0xbc   :  { %3302 = vst [vmem:[#allocation55_spill] sm:$0xff] %v2611_v63 }
  0xbe   :  { %v232_v53 = vpop.f32.mrf.mxu2 }
  0xbf   :  { %v2613_v56 = vadd.f32 %v232_v53, %v93_v5  ;;  %v273_v15 = vpop.f32.mrf.mxu3  ;;  %v405_v52 = vpop.f32.mrf.mxu0 }
  0xc0   :  { %v2615_v29 = vadd.f32 %v273_v15, %v94_v58  ;;  %v425_v51 = vpop.f32.mrf.mxu1  ;;  %v468_v2 = vadd.f32 %v405_v52, %v142_v61 }
  0xc1   :  { %3303 = vst [vmem:[#allocation56_spill] sm:$0xff] %v2613_v56  ;;  %v469_v48 = vadd.f32 %v425_v51, %v183_v49 }
  0xc2   :  { %3304 = vst [vmem:[#allocation57_spill] sm:$0xff] %v2615_v29  ;;  %v1743_v0 = vmul.f32 -1.442695, %v468_v2 }
  0xc3   :  { %v1744_v1 = vmul.f32 -1.442695, %v469_v48 }
  0xc4   :  { %1781 = vpow2.f32 %v1743_v0 }
  0xc5   :  { %1783 = vpow2.f32 %v1744_v1 }
  0xc6   :  { %v235_v59 = vpop.f32.mrf.mxu2 }
  0xc7   :  { %v2617_v54 = vadd.f32 %v235_v59, %v93_v5  ;;  %v276_v60 = vpop.f32.mrf.mxu3 }
  0xc8   :  { %v2619_v57 = vadd.f32 %v276_v60, %v94_v58 }
  0xc9   :  { %3305 = vst [vmem:[#allocation58_spill] sm:$0xff] %v2617_v54 }
  0xca   :  { %3306 = vst [vmem:[#allocation59_spill] sm:$0xff] %v2619_v57  ;;  %v1782_v3 = vpop.eup %1781 }
  0xcb   :  { %v1784_v4 = vpop.eup %1783  ;;  %v481_v61 = vadd.f32 1.0, %v1782_v3  ;;  %v224_v3 = vadd.f32 %v2589_v42, %v93_v5 }
  0xcc   :  { %v482_v51 = vadd.f32 1.0, %v1784_v4 }
  0xcd   :  { %1785 = vrcp.f32 %v481_v61  ;;  %vm489_vm3 = vweird.f32 %v481_v61  ;;  %v495_v42 = vand.u32 2147483648, %v481_v61 }
  0xce   :  { %v238_v53 = vpop.f32.mrf.mxu2  ;;  %1787 = vrcp.f32 %v482_v51  ;;  %vm504_vm4 = vweird.f32 %v482_v51 }
  0xcf   :  { %v2621_v63 = vadd.f32 %v238_v53, %v93_v5  ;;  %v279_v15 = vpop.f32.mrf.mxu3 }
  0xd0   :  { %v2623_v29 = vadd.f32 %v279_v15, %v94_v58 }
  0xd1   :  { %3307 = vst [vmem:[#allocation60_spill] sm:$0xff] %v2621_v63 }
  0xd2   :  { %3308 = vst [vmem:[#allocation61_spill] sm:$0xff] %v2623_v29  ;;  %v265_v29 = vadd.f32 %v2591_v62, %v94_v58 }
  0xd3   :  { %v1786_v0 = vpop.eup %1785 }
  0xd4   :  { %v1788_v52 = vpop.eup %1787  ;;  %v485_v53 = vmul.f32 %v1786_v0, %v481_v61  ;;  %vm490_vm1 = vweird.f32 %v1786_v0 }
  0xd5   :  { %v500_v15 = vmul.f32 %v1788_v52, %v482_v51  ;;  %vm505_vm2 = vweird.f32 %v1788_v52  ;;  %vm491_vm5 = vmor %vm489_vm3, %vm490_vm1 }
  0xd6   :  { %v241_v16 = vpop.f32.mrf.mxu2  ;;  %v486_v4 = vsub.f32 1.0, %v485_v53  ;;  %v508_v53 = vand.u32 2147483647, %v482_v51  ;;  %vm506_vm6 = vmor %vm504_vm4, %vm505_vm2 }
  0xd7   :  { %v2625_v55 = vadd.f32 %v241_v16, %v93_v5  ;;  %v282_v2 = vpop.f32.mrf.mxu3  ;;  %v501_v16 = vsub.f32 1.0, %v500_v15 }
  0xd8   :  { %v2627_v48 = vadd.f32 %v282_v2, %v94_v58  ;;  %v487_v56 = vmul.f32 %v1786_v0, %v486_v4  ;;  %vm509_vm8 = vcmp.eq.f32.partialorder %v508_v53, 8.507059e+37 }
  0xd9   :  { %3309 = vst [vmem:[#allocation62_spill] sm:$0xff] %v2625_v55  ;;  %v502_v54 = vmul.f32 %v1788_v52, %v501_v16 }
  0xda   :  { %3310 = vst [vmem:[#allocation63_spill] sm:$0xff] %v2627_v48 }
  0xde   :  { %v244_v1 = vpop.f32.mrf.mxu2 }
  0xdf   :  { %v2629_v49 = vadd.f32 %v244_v1, %v93_v5  ;;  %v285_v59 = vpop.f32.mrf.mxu3  ;;  %v488_v1 = vadd.f32 %v1786_v0, %v487_v56  ;;  %v493_v5 = vand.u32 2147483647, %v481_v61 }
  0xe0   :  { %v2631_v60 = vadd.f32 %v285_v59, %v94_v58  ;;  %v503_v59 = vadd.f32 %v1788_v52, %v502_v54 }
  0xe1   :  { %3311 = vst [vmem:[#allocation64_spill] sm:$0xff] %v2629_v49  ;;  %vm494_vm7 = vcmp.eq.f32.partialorder %v493_v5, 8.507059e+37  ;;  %v3357_v49 = vld [vmem:[#allocation44_spill] sm:$0xff] }
  0xe2   :  { %3312 = vst [vmem:[#allocation65_spill] sm:$0xff] %v2631_v60  ;;  %v510_v60 = vand.u32 2147483648, %v482_v51 }
  0xe4   :  { %v511_v15 = vor.u32 1.1754944e-38, %v510_v60 }
  0xe6   :  { %v445_v55 = vpop.f32.mrf.mxu2 }
  0xe7   :  { %v470_v2 = vadd.f32 %v445_v55, %v224_v3  ;;  %v465_v48 = vpop.f32.mrf.mxu3  ;;  %v492_v55 = vsel %vm491_vm5, %v1786_v0, %v488_v1 }
  0xe8   :  { %v471_v57 = vadd.f32 %v465_v48, %v265_v29  ;;  %v507_v29 = vsel %vm506_vm6, %v1788_v52, %v503_v59 }
  0xe9   :  { %v1745_v63 = vmul.f32 -1.442695, %v470_v2  ;;  %v512_v56 = vsel %vm509_vm8, %v511_v15, %v507_v29 }
  0xea   :  { %v530_v3 = vmul.f32 0.0, %v512_v56 }
  0xeb   :  { %1789 = vpow2.f32 %v1745_v63  ;;  %v496_v63 = vor.u32 1.1754944e-38, %v495_v42 }
  0xec   :  { %1791 = vtanh.f32 %v471_v57 }
  0xed   :  { %v497_v54 = vsel %vm494_vm7, %v496_v63, %v492_v55  ;;  %v3341_v63 = vld [vmem:[#allocation49_spill] sm:$0xff] }
  0xf1   :  { %v1790_v58 = vpop.eup %1789 }
  0xf2   :  { %v483_v62 = vadd.f32 1.0, %v1790_v58  ;;  %v1792_v48 = vpop.eup %1791 }
  0xf3   :  { %v531_v57 = vmul.f32 %v1792_v48, %v497_v54 }
  0xf4   :  { %1793 = vrcp.f32 %v483_v62  ;;  %v525_v2 = vand.u32 2147483648, %v483_v62  ;;  %v523_v52 = vand.u32 2147483647, %v483_v62  ;;  %vm519_vm10 = vweird.f32 %v483_v62 }
  0xf5   :  { %v2635_v16 = vadd.f32 %v531_v57, %v530_v3 }
  0xf6   :  { %v526_v1 = vor.u32 1.1754944e-38, %v525_v2  ;;  %vm524_vm12 = vcmp.eq.f32.partialorder %v523_v52, 8.507059e+37 }
  0xf7   :  { %1795 = vtanh.f32 %v2635_v16 }
  0xfa   :  { %v1794_v4 = vpop.eup %1793 }
  0xfb   :  { %v515_v61 = vmul.f32 %v1794_v4, %v483_v62  ;;  %vm520_vm9 = vweird.f32 %v1794_v4 }
  0xfc   :  { %vm521_vm11 = vmor %vm519_vm10, %vm520_vm9 }
  0xfd   :  { %v516_v51 = vsub.f32 1.0, %v515_v61  ;;  %v1796_v42 = vpop.eup %1795 }
  0xff   :  { %v517_v0 = vmul.f32 %v1794_v4, %v516_v51 }
 0x101   :  { %v518_v60 = vadd.f32 %v1794_v4, %v517_v0 }
 0x103   :  { %v522_v59 = vsel %vm521_vm11, %v1794_v4, %v518_v60 }
 0x104   :  { %v527_v5 = vsel %vm524_vm12, %v526_v1, %v522_v59 }
 0x105   :  { %v534_v53 = vmul.f32 %v1796_v42, %v527_v5 }
 0x107   :  { %555 = vmatmul.f32.vlgmr.msra.gmra.mxu0 %v534_v53  ;;  %575 = vmatmul.f32.vlgmr.msra.gmra.mxu1 %v534_v53 }
 0x108   :  { %595 = vmatmul.f32.vlgmr.msrb.gmra.mxu2 %v534_v53  ;;  %615 = vmatmul.f32.vlgmr.msrb.gmra.mxu3 %v534_v53 }
 0x109   :  { %841 = vmatpush.msra.mxu0 %v2170_v7  ;;  %861 = vmatpush.msra.mxu1 %v2176_v8  ;;  %v3314_v7 = vld [vmem:[#allocation13_spill] sm:$0xff]  ;;  %v3315_v8 = vld [vmem:[#allocation15_spill] sm:$0xff] }
 0x10a   :  { %881 = vmatpush.msrb.mxu2 %v2168_v6  ;;  %901 = vmatpush.msrb.mxu3 %v2191_v14  ;;  %v3313_v6 = vld [vmem:[#allocation18_spill] sm:$0xff] }
 0x10b   :  { %842 = vmatpush.msra.mxu0 %v2178_v9  ;;  %862 = vmatpush.msra.mxu1 %v2184_v11  ;;  %v3316_v9 = vld [vmem:[#allocation14_spill] sm:$0xff]  ;;  %v3318_v11 = vld [vmem:[#allocation16_spill] sm:$0xff] }
 0x10c   :  { %882 = vmatpush.msrb.mxu2 %v2180_v10  ;;  %902 = vmatpush.msrb.mxu3 %v2219_v20  ;;  %v3317_v10 = vld [vmem:[#allocation24_spill] sm:$0xff]  ;;  %v3321_v14 = vld [vmem:[#allocation26_spill] sm:$0xff]  ;;  %v3325_v20 = vld [vmem:[#allocation33_spill] sm:$0xff] }
 0x10d   :  { %843 = vmatpush.msra.mxu0 %v2187_v12  ;;  %863 = vmatpush.msra.mxu1 %v2208_v17  ;;  %v3319_v12 = vld [vmem:[#allocation19_spill] sm:$0xff]  ;;  %v3322_v17 = vld [vmem:[#allocation20_spill] sm:$0xff] }
 0x10e   :  { %883 = vmatpush.msrb.mxu2 %v2189_v13  ;;  %903 = vmatpush.msrb.mxu3 %v2233_v24  ;;  %v3320_v13 = vld [vmem:[#allocation17_spill] sm:$0xff]  ;;  %v3329_v24 = vld [vmem:[#allocation34_spill] sm:$0xff] }
 0x10f   :  { %844 = vmatpush.msra.mxu0 %v2210_v18  ;;  %864 = vmatpush.msra.mxu1 %v2225_v21  ;;  %v3323_v18 = vld [vmem:[#allocation21_spill] sm:$0xff]  ;;  %v3326_v21 = vld [vmem:[#allocation22_spill] sm:$0xff] }
 0x110   :  { %884 = vmatpush.msrb.mxu2 %v2217_v19  ;;  %904 = vmatpush.msrb.mxu3 %v2245_v28  ;;  %v3324_v19 = vld [vmem:[#allocation23_spill] sm:$0xff]  ;;  %v3333_v28 = vld [vmem:[#allocation36_spill] sm:$0xff] }
 0x111   :  { %845 = vmatpush.msra.mxu0 %v2227_v22  ;;  %865 = vmatpush.msra.mxu1 %v2235_v25  ;;  %v3327_v22 = vld [vmem:[#allocation27_spill] sm:$0xff]  ;;  %v3330_v25 = vld [vmem:[#allocation28_spill] sm:$0xff] }
 0x112   :  { %885 = vmatpush.msrb.mxu2 %v2231_v23  ;;  %905 = vmatpush.msrb.mxu3 %v2268_v33  ;;  %v3328_v23 = vld [vmem:[#allocation25_spill] sm:$0xff] }
 0x113   :  { %846 = vmatpush.msra.mxu0 %v2237_v26  ;;  %866 = vmatpush.msra.mxu1 %v2256_v30  ;;  %v3331_v26 = vld [vmem:[#allocation29_spill] sm:$0xff]  ;;  %v3334_v30 = vld [vmem:[#allocation30_spill] sm:$0xff] }
 0x114   :  { %886 = vmatpush.msrb.mxu2 %v2243_v27  ;;  %906 = vmatpush.msrb.mxu3 %v2282_v37  ;;  %v3332_v27 = vld [vmem:[#allocation32_spill] sm:$0xff]  ;;  %v3337_v33 = vld [vmem:[#allocation37_spill] sm:$0xff] }
 0x115   :  { %847 = vmatpush.msra.mxu0 %v2258_v31  ;;  %867 = vmatpush.msra.mxu1 %v2274_v34  ;;  %v3335_v31 = vld [vmem:[#allocation31_spill] sm:$0xff] }
 0x116   :  { %887 = vmatpush.msrb.mxu2 %v2262_v32  ;;  %907 = vmatpush.msrb.mxu3 %v2294_v41  ;;  %v3336_v32 = vld [vmem:[#allocation35_spill] sm:$0xff] }
 0x117   :  { %848 = vmatpush.msra.mxu0 %v2276_v35  ;;  %868 = vmatpush.msra.mxu1 %v2284_v38  ;;  %v3339_v38 = vld [vmem:[#allocation41_spill] sm:$0xff] }
 0x118   :  { %888 = vmatpush.msrb.mxu2 %v2280_v36  ;;  %908 = vmatpush.msrb.mxu3 %v2317_v46  ;;  %v3338_v36 = vld [vmem:[#allocation40_spill] sm:$0xff] }
 0x119   :  { %849 = vmatpush.msra.mxu0 %v2286_v39  ;;  %869 = vmatpush.msra.mxu1 %v2305_v43 }
 0x11a   :  { %889 = vmatpush.msrb.mxu2 %v2292_v40  ;;  %909 = vmatpush.msrb.mxu3 %v2331_v50 }
 0x11b   :  { %850 = vmatpush.msra.mxu0 %v2307_v44  ;;  %870 = vmatpush.msra.mxu1 %v2323_v47  ;;  %v3340_v44 = vld [vmem:[#allocation48_spill] sm:$0xff] }
 0x11c   :  { %890 = vmatpush.msrb.mxu2 %v2315_v45  ;;  %910 = vmatpush.msrb.mxu3 %v3313_v6 }
 0x11d   :  { %851 = vmatpush.msra.mxu0 %v3314_v7  ;;  %871 = vmatpush.msra.mxu1 %v3315_v8 }
 0x11e   :  { %891 = vmatpush.msrb.mxu2 %v3316_v9  ;;  %911 = vmatpush.msrb.mxu3 %v3317_v10 }
 0x11f   :  { %852 = vmatpush.msra.mxu0 %v3318_v11  ;;  %872 = vmatpush.msra.mxu1 %v3319_v12 }
 0x120   :  { %892 = vmatpush.msrb.mxu2 %v3320_v13  ;;  %912 = vmatpush.msrb.mxu3 %v3321_v14 }
 0x121   :  { %853 = vmatpush.msra.mxu0 %v3322_v17  ;;  %873 = vmatpush.msra.mxu1 %v3323_v18 }
 0x122   :  { %893 = vmatpush.msrb.mxu2 %v3324_v19  ;;  %913 = vmatpush.msrb.mxu3 %v3325_v20 }
 0x123   :  { %854 = vmatpush.msra.mxu0 %v3326_v21  ;;  %874 = vmatpush.msra.mxu1 %v3327_v22 }
 0x124   :  { %894 = vmatpush.msrb.mxu2 %v3328_v23  ;;  %914 = vmatpush.msrb.mxu3 %v3329_v24 }
 0x125   :  { %855 = vmatpush.msra.mxu0 %v3330_v25  ;;  %875 = vmatpush.msra.mxu1 %v3331_v26 }
 0x126   :  { %895 = vmatpush.msrb.mxu2 %v3332_v27  ;;  %915 = vmatpush.msrb.mxu3 %v3333_v28 }
 0x127   :  { %856 = vmatpush.msra.mxu0 %v3334_v30  ;;  %876 = vmatpush.msra.mxu1 %v3335_v31 }
 0x128   :  { %896 = vmatpush.msrb.mxu2 %v3336_v32  ;;  %916 = vmatpush.msrb.mxu3 %v3337_v33 }
 0x184   :  { %v556_v34 = vpop.f32.mrf.mxu0  ;;  %v576_v35 = vpop.f32.mrf.mxu1 }
 0x185   :  { %v619_v37 = vadd.f32 %v556_v34, %v3338_v36  ;;  %v620_v39 = vadd.f32 %v576_v35, %v3339_v38 }
 0x187   :  { %v1746_v40 = vmul.f32 -1.442695, %v619_v37  ;;  %v1747_v41 = vmul.f32 -1.442695, %v620_v39 }
 0x189   :  { %1797 = vpow2.f32 %v1746_v40  ;;  %v2713_v40 = vld [vmem:[#allocation3 + $0x1e8] sm:$0xff] }
 0x18a   :  { %1799 = vpow2.f32 %v1747_v41  ;;  %v2716_v41 = vld [vmem:[#allocation3 + $0x1f0] sm:$0xff] }
 0x18b   :  { %v596_v43 = vpop.f32.mrf.mxu2  ;;  %v616_v55 = vpop.f32.mrf.mxu3 }
 0x18c   :  { %v621_v45 = vadd.f32 %v596_v43, %v3340_v44  ;;  %v622_v54 = vadd.f32 %v616_v55, %v3341_v63  ;;  %v2719_v43 = vld [vmem:[#allocation3 + $0x1f8] sm:$0xff]  ;;  %v2722_v44 = vld [vmem:[#allocation3 + $0x1c0] sm:$0xff] }
 0x18d   :  { %v2743_v55 = vld [vmem:[#allocation3 + $0x1b8] sm:$0xff] }
 0x18e   :  { %v1748_v46 = vmul.f32 -1.442695, %v621_v45  ;;  %v2725_v45 = vld [vmem:[#allocation3 + $0x1c8] sm:$0xff]  ;;  %v2755_v63 = vld [vmem:[#allocation3 + $0x198] sm:$0xff] }
 0x18f   :  { %v1798_v47 = vpop.eup %1797 }
 0x190   :  { %v1800_v50 = vpop.eup %1799  ;;  %v632_v58 = vadd.f32 1.0, %v1798_v47  ;;  %1801 = vpow2.f32 %v1748_v46  ;;  %v2728_v46 = vld [vmem:[#allocation3 + $0x1d0] sm:$0xff]  ;;  %v2731_v47 = vld [vmem:[#allocation3 + $0x1d8] sm:$0xff] }
 0x191   :  { %v633_v62 = vadd.f32 1.0, %v1800_v50  ;;  %v2734_v50 = vld [vmem:[#allocation3 + $0x1a0] sm:$0xff] }
 0x192   :  { %1803 = vrcp.f32 %v632_v58  ;;  %v646_v51 = vand.u32 2147483648, %v632_v58  ;;  %v644_v52 = vand.u32 2147483647, %v632_v58  ;;  %vm640_vm15 = vweird.f32 %v632_v58 }
 0x193   :  { %1805 = vrcp.f32 %v633_v62  ;;  %v661_v2 = vand.u32 2147483648, %v633_v62  ;;  %v659_v1 = vand.u32 2147483647, %v633_v62  ;;  %vm655_vm0 = vweird.f32 %v633_v62 }
 0x194   :  { %v647_v53 = vor.u32 1.1754944e-38, %v646_v51  ;;  %vm645_vm3 = vcmp.eq.f32.partialorder %v644_v52, 8.507059e+37  ;;  %v2776_v51 = vld [vmem:[#allocation3 + $0x150] sm:$0xff]  ;;  %v2785_v52 = vld [vmem:[#allocation3 + $0x128] sm:$0xff] }
 0x195   :  { %v662_v7 = vor.u32 1.1754944e-38, %v661_v2  ;;  %vm660_vm4 = vcmp.eq.f32.partialorder %v659_v1, 8.507059e+37  ;;  %v2779_v2 = vld [vmem:[#allocation3 + $0x158] sm:$0xff] }
 0x196   :  { %v1802_v29 = vpop.eup %1801  ;;  %v2791_v1 = vld [vmem:[#allocation3 + $0x138] sm:$0xff] }
 0x197   :  { %v634_v48 = vadd.f32 1.0, %v1802_v29  ;;  %v2746_v29 = vld [vmem:[#allocation3 + $0x180] sm:$0xff] }
 0x198   :  { %v1804_v15 = vpop.eup %1803 }
 0x199   :  { %v1806_v56 = vpop.eup %1805  ;;  %v636_v57 = vmul.f32 %v1804_v15, %v632_v58  ;;  %1807 = vrcp.f32 %v634_v48  ;;  %vm641_vm13 = vweird.f32 %v1804_v15  ;;  %v676_v25 = vand.u32 2147483648, %v634_v48  ;;  %v2737_v58 = vld [vmem:[#allocation3 + $0x1a8] sm:$0xff] }
 0x19a   :  { %v651_v3 = vmul.f32 %v1806_v56, %v633_v62  ;;  %1809 = vtanh.f32 %v622_v54  ;;  %vm656_vm14 = vweird.f32 %v1806_v56  ;;  %vm642_vm1 = vmor %vm640_vm15, %vm641_vm13  ;;  %vm670_vm6 = vweird.f32 %v634_v48  ;;  %v2740_v62 = vld [vmem:[#allocation3 + $0x1b0] sm:$0xff]  ;;  %v2758_v54 = vld [vmem:[#allocation3 + $0x160] sm:$0xff] }
 0x19b   :  { %v637_v4 = vsub.f32 1.0, %v636_v57  ;;  %vm657_vm2 = vmor %vm655_vm0, %vm656_vm14  ;;  %v674_v34 = vand.u32 2147483647, %v634_v48  ;;  %v677_v36 = vor.u32 1.1754944e-38, %v676_v25  ;;  %v2764_v57 = vld [vmem:[#allocation3 + $0x170] sm:$0xff]  ;;  %v2843_v25 = vld [vmem:[#allocation3 + $0x88] sm:$0xff] }
 0x19c   :  { %v652_v61 = vsub.f32 1.0, %v651_v3  ;;  %v2767_v3 = vld [vmem:[#allocation3 + $0x178] sm:$0xff]  ;;  %3348 = vst [vmem:[#allocation19_spill] sm:$0xff] %v2843_v25 }
 0x19d   :  { %v638_v0 = vmul.f32 %v1804_v15, %v637_v4  ;;  %vm675_vm8 = vcmp.eq.f32.partialorder %v674_v34, 8.507059e+37  ;;  %v2770_v4 = vld [vmem:[#allocation3 + $0x140] sm:$0xff]  ;;  %v2846_v34 = vld [vmem:[#allocation3 + $0x90] sm:$0xff] }
 0x19e   :  { %v653_v60 = vmul.f32 %v1806_v56, %v652_v61  ;;  %v2773_v61 = vld [vmem:[#allocation3 + $0x148] sm:$0xff]  ;;  %3349 = vst [vmem:[#allocation17_spill] sm:$0xff] %v2846_v34 }
 0x19f   :  { %v1808_v59 = vpop.eup %1807  ;;  %v639_v42 = vadd.f32 %v1804_v15, %v638_v0  ;;  %v2782_v0 = vld [vmem:[#allocation3 + $0x120] sm:$0xff] }
 0x1a0   :  { %v666_v5 = vmul.f32 %v1808_v59, %v634_v48  ;;  %v654_v6 = vadd.f32 %v1806_v56, %v653_v60  ;;  %v1810_v9 = vpop.eup %1809  ;;  %vm671_vm5 = vweird.f32 %v1808_v59  ;;  %v2749_v48 = vld [vmem:[#allocation3 + $0x188] sm:$0xff]  ;;  %v2788_v60 = vld [vmem:[#allocation3 + $0x130] sm:$0xff] }
 0x1a1   :  { %v643_v8 = vsel %vm642_vm1, %v1804_v15, %v639_v42  ;;  %vm672_vm7 = vmor %vm670_vm6, %vm671_vm5  ;;  %v2752_v15 = vld [vmem:[#allocation3 + $0x190] sm:$0xff]  ;;  %v2797_v42 = vld [vmem:[#allocation3 + $0x108] sm:$0xff] }
 0x1a2   :  { %v667_v11 = vsub.f32 1.0, %v666_v5  ;;  %v648_v12 = vsel %vm645_vm3, %v647_v53, %v643_v8  ;;  %v658_v13 = vsel %vm657_vm2, %v1806_v56, %v654_v6  ;;  %v2761_v56 = vld [vmem:[#allocation3 + $0x168] sm:$0xff]  ;;  %v2800_v5 = vld [vmem:[#allocation3 + $0x110] sm:$0xff]  ;;  %v2803_v53 = vld [vmem:[#allocation3 + $0x118] sm:$0xff] }
 0x1a3   :  { %v663_v17 = vsel %vm660_vm4, %v662_v7, %v658_v13  ;;  %v682_v18 = vmul.f32 %v1810_v9, %v648_v12  ;;  %v2806_v6 = vld [vmem:[#allocation3 + $0xe0] sm:$0xff]  ;;  %v2809_v7 = vld [vmem:[#allocation3 + $0xe8] sm:$0xff]  ;;  %v2812_v8 = vld [vmem:[#allocation3 + $0xf0] sm:$0xff] }
 0x1a4   :  { %v681_v19 = vmul.f32 %v663_v17, %v2635_v16  ;;  %v668_v21 = vmul.f32 %v1808_v59, %v667_v11  ;;  %v2710_v16 = vld [vmem:[#allocation3 + $0x1e0] sm:$0xff]  ;;  %v2815_v9 = vld [vmem:[#allocation3 + $0xf8] sm:$0xff]  ;;  %v2821_v12 = vld [vmem:[#allocation3 + $0xc8] sm:$0xff] }
 0x1a5   :  { %v2818_v11 = vld [vmem:[#allocation3 + $0xc0] sm:$0xff]  ;;  %v2824_v13 = vld [vmem:[#allocation3 + $0xd0] sm:$0xff]  ;;  %v2827_v17 = vld [vmem:[#allocation3 + $0xd8] sm:$0xff] }
 0x1a6   :  { %v2707_v22 = vadd.f32 %v682_v18, %v681_v19  ;;  %v669_v23 = vadd.f32 %v1808_v59, %v668_v21  ;;  %3342 = vst [vmem:[#allocation18_spill] sm:$0xff] %v2824_v13  ;;  %v2830_v18 = vld [vmem:[#allocation3 + $0xa0] sm:$0xff]  ;;  %v2833_v19 = vld [vmem:[#allocation3 + $0xa8] sm:$0xff]  ;;  %v2836_v21 = vld [vmem:[#allocation3 + $0xb0] sm:$0xff] }
 0x1a7   :  { %3343 = vst [vmem:[#allocation13_spill] sm:$0xff] %v2827_v17 }
 0x1a8   :  { %1811 = vtanh.f32 %v2707_v22  ;;  %v673_v35 = vsel %vm672_vm7, %v1808_v59, %v669_v23  ;;  %v2794_v59 = vld [vmem:[#allocation3 + $0x100] sm:$0xff]  ;;  %3344 = vst [vmem:[#allocation15_spill] sm:$0xff] %v2830_v18 }
 0x1a9   :  { %v678_v38 = vsel %vm675_vm8, %v677_v36, %v673_v35  ;;  %3345 = vst [vmem:[#allocation14_spill] sm:$0xff] %v2833_v19  ;;  %v2840_v23 = vld [vmem:[#allocation3 + $0x80] sm:$0xff]  ;;  %v2853_v36 = vld [vmem:[#allocation3 + $0x68] sm:$0xff] }
 0x1aa   :  { %3346 = vst [vmem:[#allocation24_spill] sm:$0xff] %v2836_v21  ;;  %v2850_v35 = vld [vmem:[#allocation3 + $0x60] sm:$0xff] }
 0x1ab   :  { %3347 = vst [vmem:[#allocation16_spill] sm:$0xff] %v2840_v23 }
 0x1ac   :  { %3350 = vst [vmem:[#allocation26_spill] sm:$0xff] %v2850_v35 }
 0x1ad   :  { %3351 = vst [vmem:[#allocation20_spill] sm:$0xff] %v2853_v36 }
 0x1ae   :  { %v1812_v37 = vpop.eup %1811 }
 0x1af   :  { %v685_v39 = vmul.f32 %v1812_v37, %v678_v38  ;;  %v2860_v37 = vld [vmem:[#allocation3 + $0x40] sm:$0xff]  ;;  %v2863_v38 = vld [vmem:[#allocation3 + $0x48] sm:$0xff] }
 0x1b0   :  { %3353 = vst [vmem:[#allocation23_spill] sm:$0xff] %v2860_v37 }
 0x1b1   :  { %706 = vmatmul.f32.vlgmr.msrb.gmra.mxu0 %v685_v39  ;;  %726 = vmatmul.f32.vlgmr.msrb.gmra.mxu1 %v685_v39  ;;  %3354 = vst [vmem:[#allocation33_spill] sm:$0xff] %v2863_v38 }
 0x1b2   :  { %746 = vmatmul.f32.vlgmr.msra.gmra.mxu2 %v685_v39  ;;  %766 = vmatmul.f32.vlgmr.msra.gmra.mxu3 %v685_v39  ;;  %v2870_v39 = vld [vmem:[#allocation3 + $0x20] sm:$0xff] }
 0x1b3   :  { %992 = vmatpush.msrb.mxu0 %v2710_v16  ;;  %1012 = vmatpush.msrb.mxu1 %v2713_v40  ;;  %3356 = vst [vmem:[#allocation27_spill] sm:$0xff] %v2870_v39 }
 0x1b4   :  { %1032 = vmatpush.msra.mxu2 %v2716_v41  ;;  %1052 = vmatpush.msra.mxu3 %v2719_v43 }
 0x1b5   :  { %993 = vmatpush.msrb.mxu0 %v2722_v44  ;;  %1013 = vmatpush.msrb.mxu1 %v2725_v45 }
 0x1b6   :  { %1033 = vmatpush.msra.mxu2 %v2728_v46  ;;  %1053 = vmatpush.msra.mxu3 %v2731_v47 }
 0x1b7   :  { %994 = vmatpush.msrb.mxu0 %v2734_v50  ;;  %1014 = vmatpush.msrb.mxu1 %v2737_v58 }
 0x1b8   :  { %1034 = vmatpush.msra.mxu2 %v2740_v62  ;;  %1054 = vmatpush.msra.mxu3 %v2743_v55 }
 0x1b9   :  { %995 = vmatpush.msrb.mxu0 %v2746_v29  ;;  %1015 = vmatpush.msrb.mxu1 %v2749_v48 }
 0x1ba   :  { %1035 = vmatpush.msra.mxu2 %v2752_v15  ;;  %1055 = vmatpush.msra.mxu3 %v2755_v63 }
 0x1bb   :  { %996 = vmatpush.msrb.mxu0 %v2758_v54  ;;  %1016 = vmatpush.msrb.mxu1 %v2761_v56 }
 0x1bc   :  { %1036 = vmatpush.msra.mxu2 %v2764_v57  ;;  %1056 = vmatpush.msra.mxu3 %v2767_v3 }
 0x1bd   :  { %997 = vmatpush.msrb.mxu0 %v2770_v4  ;;  %1017 = vmatpush.msrb.mxu1 %v2773_v61 }
 0x1be   :  { %1037 = vmatpush.msra.mxu2 %v2776_v51  ;;  %1057 = vmatpush.msra.mxu3 %v2779_v2 }
 0x1bf   :  { %998 = vmatpush.msrb.mxu0 %v2782_v0  ;;  %1018 = vmatpush.msrb.mxu1 %v2785_v52 }
 0x1c0   :  { %1038 = vmatpush.msra.mxu2 %v2788_v60  ;;  %1058 = vmatpush.msra.mxu3 %v2791_v1 }
 0x1c1   :  { %999 = vmatpush.msrb.mxu0 %v2794_v59  ;;  %1019 = vmatpush.msrb.mxu1 %v2797_v42 }
 0x1c2   :  { %1039 = vmatpush.msra.mxu2 %v2800_v5  ;;  %1059 = vmatpush.msra.mxu3 %v2803_v53 }
 0x1c3   :  { %1000 = vmatpush.msrb.mxu0 %v2806_v6  ;;  %1020 = vmatpush.msrb.mxu1 %v2809_v7 }
 0x1c4   :  { %1040 = vmatpush.msra.mxu2 %v2812_v8  ;;  %1060 = vmatpush.msra.mxu3 %v2815_v9 }
 0x1c5   :  { %1001 = vmatpush.msrb.mxu0 %v2818_v11  ;;  %1021 = vmatpush.msrb.mxu1 %v2821_v12 }
 0x1c6   :  { %1041 = vmatpush.msra.mxu2 %v2824_v13  ;;  %1061 = vmatpush.msra.mxu3 %v2827_v17 }
 0x1c7   :  { %1002 = vmatpush.msrb.mxu0 %v2830_v18  ;;  %1022 = vmatpush.msrb.mxu1 %v2833_v19 }
 0x1c8   :  { %1042 = vmatpush.msra.mxu2 %v2836_v21  ;;  %1062 = vmatpush.msra.mxu3 %v3317_v10  ;;  %v2856_v10 = vld [vmem:[#allocation3 + $0x70] sm:$0xff] }
 0x1c9   :  { %1003 = vmatpush.msrb.mxu0 %v2840_v23  ;;  %1023 = vmatpush.msrb.mxu1 %v2843_v25  ;;  %3352 = vst [vmem:[#allocation21_spill] sm:$0xff] %v2856_v10 }
 0x1ca   :  { %1043 = vmatpush.msra.mxu2 %v2846_v34  ;;  %1063 = vmatpush.msra.mxu3 %v3321_v14  ;;  %v2866_v14 = vld [vmem:[#allocation3 + $0x50] sm:$0xff] }
 0x1cb   :  { %1004 = vmatpush.msrb.mxu0 %v2850_v35  ;;  %1024 = vmatpush.msrb.mxu1 %v2853_v36  ;;  %3355 = vst [vmem:[#allocation22_spill] sm:$0xff] %v2866_v14 }
 0x1cc   :  { %1044 = vmatpush.msra.mxu2 %v2856_v10  ;;  %1064 = vmatpush.msra.mxu3 %v3325_v20 }
 0x1cd   :  { %1005 = vmatpush.msrb.mxu0 %v2860_v37  ;;  %1025 = vmatpush.msrb.mxu1 %v2863_v38  ;;  %v3358_v38 = vld [vmem:[#allocation45_spill] sm:$0xff] }
 0x1ce   :  { %1045 = vmatpush.msra.mxu2 %v2866_v14  ;;  %1065 = vmatpush.msra.mxu3 %v3329_v24 }
 0x1cf   :  { %1006 = vmatpush.msrb.mxu0 %v2870_v39  ;;  %1026 = vmatpush.msrb.mxu1 %v3331_v26 }
 0x1d0   :  { %1046 = vmatpush.msra.mxu2 %v3332_v27  ;;  %1066 = vmatpush.msra.mxu3 %v3333_v28  ;;  %v3359_v28 = vld [vmem:[#allocation52_spill] sm:$0xff] }
 0x1d1   :  { %1007 = vmatpush.msrb.mxu0 %v3334_v30  ;;  %1027 = vmatpush.msrb.mxu1 %v3335_v31 }
 0x1d2   :  { %1047 = vmatpush.msra.mxu2 %v3336_v32  ;;  %1067 = vmatpush.msra.mxu3 %v3337_v33 }
 0x22e   :  { %v707_v20 = vpop.f32.mrf.mxu0  ;;  %v727_v24 = vpop.f32.mrf.mxu1 }
 0x22f   :  { %v770_v14 = vadd.f32 %v707_v20, %v3357_v49  ;;  %v771_v39 = vadd.f32 %v727_v24, %v3358_v38  ;;  %v3360_v38 = vld [vmem:[#allocation53_spill] sm:$0xff] }
 0x231   :  { %v1749_v37 = vmul.f32 -1.442695, %v770_v14  ;;  %v1750_v26 = vmul.f32 -1.442695, %v771_v39 }
 0x233   :  { %1813 = vpow2.f32 %v1749_v37 }
 0x234   :  { %1815 = vpow2.f32 %v1750_v26 }
 0x235   :  { %v747_v27 = vpop.f32.mrf.mxu2  ;;  %v767_v33 = vpop.f32.mrf.mxu3 }
 0x236   :  { %v772_v10 = vadd.f32 %v747_v27, %v3359_v28  ;;  %v773_v14 = vadd.f32 %v767_v33, %v3360_v38 }
 0x238   :  { %v1751_v30 = vmul.f32 -1.442695, %v772_v10 }
 0x239   :  { %v1814_v36 = vpop.eup %1813 }
 0x23a   :  { %v1816_v31 = vpop.eup %1815  ;;  %v783_v35 = vadd.f32 1.0, %v1814_v36  ;;  %1817 = vpow2.f32 %v1751_v30 }
 0x23b   :  { %v784_v32 = vadd.f32 1.0, %v1816_v31 }
 0x23c   :  { %1819 = vrcp.f32 %v783_v35  ;;  %v797_v10 = vand.u32 2147483648, %v783_v35  ;;  %v795_v30 = vand.u32 2147483647, %v783_v35  ;;  %vm791_vm11 = vweird.f32 %v783_v35 }
 0x23d   :  { %1821 = vrcp.f32 %v784_v32  ;;  %v812_v28 = vand.u32 2147483648, %v784_v32  ;;  %v810_v25 = vand.u32 2147483647, %v784_v32  ;;  %vm806_vm12 = vweird.f32 %v784_v32 }
 0x23e   :  { %v798_v38 = vor.u32 1.1754944e-38, %v797_v10  ;;  %vm796_vm15 = vcmp.eq.f32.partialorder %v795_v30, 8.507059e+37 }
 0x23f   :  { %vm811_vm0 = vcmp.eq.f32.partialorder %v810_v25, 8.507059e+37 }
 0x240   :  { %v1818_v34 = vpop.eup %1817 }
 0x241   :  { %v785_v49 = vadd.f32 1.0, %v1818_v34 }
 0x242   :  { %v1820_v20 = vpop.eup %1819 }
 0x243   :  { %v1822_v39 = vpop.eup %1821  ;;  %v787_v37 = vmul.f32 %v1820_v20, %v783_v35  ;;  %1823 = vrcp.f32 %v785_v49  ;;  %vm792_vm9 = vweird.f32 %v1820_v20  ;;  %v827_v10 = vand.u32 2147483648, %v785_v49 }
 0x244   :  { %v802_v24 = vmul.f32 %v1822_v39, %v784_v32  ;;  %1825 = vtanh.f32 %v773_v14  ;;  %vm807_vm10 = vweird.f32 %v1822_v39  ;;  %vm793_vm13 = vmor %vm791_vm11, %vm792_vm9  ;;  %vm821_vm2 = vweird.f32 %v785_v49 }
 0x245   :  { %v788_v26 = vsub.f32 1.0, %v787_v37  ;;  %vm808_vm14 = vmor %vm806_vm12, %vm807_vm10  ;;  %v813_v37 = vor.u32 1.1754944e-38, %v812_v28  ;;  %v828_v30 = vor.u32 1.1754944e-38, %v827_v10  ;;  %v3379_v10 = vld [vmem:[#allocation27_spill] sm:$0xff] }
 0x246   :  { %v803_v27 = vsub.f32 1.0, %v802_v24 }
 0x247   :  { %v789_v36 = vmul.f32 %v1820_v20, %v788_v26 }
 0x248   :  { %v804_v31 = vmul.f32 %v1822_v39, %v803_v27 }
 0x249   :  { %v1824_v23 = vpop.eup %1823  ;;  %v790_v34 = vadd.f32 %v1820_v20, %v789_v36 }
 0x24a   :  { %v817_v33 = vmul.f32 %v1824_v23, %v785_v49  ;;  %v805_v21 = vadd.f32 %v1822_v39, %v804_v31  ;;  %v1826_v14 = vpop.eup %1825  ;;  %vm822_vm1 = vweird.f32 %v1824_v23  ;;  %v3368_v31 = vld [vmem:[#allocation19_spill] sm:$0xff] }
 0x24b   :  { %v794_v24 = vsel %vm793_vm13, %v1820_v20, %v790_v34  ;;  %v825_v20 = vand.u32 2147483647, %v785_v49  ;;  %vm823_vm3 = vmor %vm821_vm2, %vm822_vm1  ;;  %v2931_v49 = vld [vmem:[#allocation3 + $0xb8] sm:$0xff]  ;;  %v3369_v34 = vld [vmem:[#allocation17_spill] sm:$0xff] }
 0x24c   :  { %v818_v19 = vsub.f32 1.0, %v817_v33  ;;  %v799_v26 = vsel %vm796_vm15, %v798_v38, %v794_v24  ;;  %v809_v18 = vsel %vm808_vm14, %v1822_v39, %v805_v21  ;;  %3366 = vst [vmem:[#allocation25_spill] sm:$0xff] %v2931_v49  ;;  %v3367_v39 = vld [vmem:[#allocation16_spill] sm:$0xff]  ;;  %v2937_v33 = vld [vmem:[#allocation3 + $0x98] sm:$0xff]  ;;  %v3371_v38 = vld [vmem:[#allocation26_spill] sm:$0xff] }
 0x24d   :  { %v814_v27 = vsel %vm811_vm0, %v813_v37, %v809_v18  ;;  %v833_v17 = vmul.f32 %v1826_v14, %v799_v26  ;;  %vm826_vm4 = vcmp.eq.f32.partialorder %v825_v20, 8.507059e+37  ;;  %3370 = vst [vmem:[#allocation34_spill] sm:$0xff] %v2937_v33  ;;  %v3372_v37 = vld [vmem:[#allocation20_spill] sm:$0xff]  ;;  %v3373_v24 = vld [vmem:[#allocation21_spill] sm:$0xff]  ;;  %v2943_v14 = vld [vmem:[#allocation3 + $0x78] sm:$0xff] }
 0x24e   :  { %v832_v13 = vmul.f32 %v814_v27, %v2707_v22  ;;  %v819_v36 = vmul.f32 %v1824_v23, %v818_v19  ;;  %v3361_v22 = vld [vmem:[#allocation18_spill] sm:$0xff]  ;;  %3374 = vst [vmem:[#allocation28_spill] sm:$0xff] %v2943_v14  ;;  %v3375_v26 = vld [vmem:[#allocation23_spill] sm:$0xff]  ;;  %v3376_v27 = vld [vmem:[#allocation33_spill] sm:$0xff] }
 0x24f   :  { %v3364_v19 = vld [vmem:[#allocation14_spill] sm:$0xff]  ;;  %v2953_v20 = vld [vmem:[#allocation3 + $0x28] sm:$0xff] }
 0x250   :  { %v2885_v35 = vadd.f32 %v833_v17, %v832_v13  ;;  %v820_v32 = vadd.f32 %v1824_v23, %v819_v36  ;;  %v3362_v13 = vld [vmem:[#allocation13_spill] sm:$0xff]  ;;  %v3363_v17 = vld [vmem:[#allocation15_spill] sm:$0xff]  ;;  %v3377_v36 = vld [vmem:[#allocation22_spill] sm:$0xff]  ;;  %3380 = vst [vmem:[#allocation32_spill] sm:$0xff] %v2953_v20 }
 0x252   :  { %1827 = vtanh.f32 %v2885_v35  ;;  %v824_v28 = vsel %vm823_vm3, %v1824_v23, %v820_v32  ;;  %v3365_v23 = vld [vmem:[#allocation24_spill] sm:$0xff]  ;;  %v2949_v32 = vld [vmem:[#allocation3 + $0x58] sm:$0xff] }
 0x253   :  { %v829_v25 = vsel %vm826_vm4, %v828_v30, %v824_v28  ;;  %3378 = vst [vmem:[#allocation29_spill] sm:$0xff] %v2949_v32  ;;  %v2956_v28 = vld [vmem:[#allocation3 + $0x30] sm:$0xff]  ;;  %v2959_v30 = vld [vmem:[#allocation3 + $0x38] sm:$0xff] }
 0x254   :  { %3381 = vst [vmem:[#allocation36_spill] sm:$0xff] %v2956_v28 }
 0x255   :  { %3382 = vst [vmem:[#allocation30_spill] sm:$0xff] %v2959_v30 }
 0x258   :  { %v1828_v21 = vpop.eup %1827 }
 0x259   :  { %v836_v18 = vmul.f32 %v1828_v21, %v829_v25  ;;  %v2962_v21 = vld [vmem:[#allocation3] sm:$0xff]  ;;  %v2965_v25 = vld [vmem:[#allocation3 + $0x8] sm:$0xff] }
 0x25a   :  { %3383 = vst [vmem:[#allocation31_spill] sm:$0xff] %v2962_v21 }
 0x25b   :  { %857 = vmatmul.f32.vlgmr.msra.gmra.mxu0 %v836_v18  ;;  %877 = vmatmul.f32.vlgmr.msra.gmra.mxu1 %v836_v18  ;;  %3384 = vst [vmem:[#allocation35_spill] sm:$0xff] %v2965_v25 }
 0x25c   :  { %897 = vmatmul.f32.vlgmr.msrb.gmra.mxu2 %v836_v18  ;;  %917 = vmatmul.f32.vlgmr.msrb.gmra.mxu3 %v836_v18  ;;  %v2968_v18 = vld [vmem:[#allocation3 + $0x10] sm:$0xff] }
 0x25d   :  { %1143 = vmatpush.msra.mxu0 %v2710_v16  ;;  %1163 = vmatpush.msra.mxu1 %v2713_v40  ;;  %3385 = vst [vmem:[#allocation37_spill] sm:$0xff] %v2968_v18 }
 0x25e   :  { %1183 = vmatpush.msrb.mxu2 %v2716_v41  ;;  %1203 = vmatpush.msrb.mxu3 %v2719_v43 }
 0x25f   :  { %1144 = vmatpush.msra.mxu0 %v2722_v44  ;;  %1164 = vmatpush.msra.mxu1 %v2725_v45 }
 0x260   :  { %1184 = vmatpush.msrb.mxu2 %v2728_v46  ;;  %1204 = vmatpush.msrb.mxu3 %v2731_v47 }
 0x261   :  { %1145 = vmatpush.msra.mxu0 %v2734_v50  ;;  %1165 = vmatpush.msra.mxu1 %v2737_v58 }
 0x262   :  { %1185 = vmatpush.msrb.mxu2 %v2740_v62  ;;  %1205 = vmatpush.msrb.mxu3 %v2743_v55 }
 0x263   :  { %1146 = vmatpush.msra.mxu0 %v2746_v29  ;;  %1166 = vmatpush.msra.mxu1 %v2749_v48 }
 0x264   :  { %1186 = vmatpush.msrb.mxu2 %v2752_v15  ;;  %1206 = vmatpush.msrb.mxu3 %v2755_v63 }
 0x265   :  { %1147 = vmatpush.msra.mxu0 %v2758_v54  ;;  %1167 = vmatpush.msra.mxu1 %v2761_v56 }
 0x266   :  { %1187 = vmatpush.msrb.mxu2 %v2764_v57  ;;  %1207 = vmatpush.msrb.mxu3 %v2767_v3 }
 0x267   :  { %1148 = vmatpush.msra.mxu0 %v2770_v4  ;;  %1168 = vmatpush.msra.mxu1 %v2773_v61 }
 0x268   :  { %1188 = vmatpush.msrb.mxu2 %v2776_v51  ;;  %1208 = vmatpush.msrb.mxu3 %v2779_v2 }
 0x269   :  { %1149 = vmatpush.msra.mxu0 %v2782_v0  ;;  %1169 = vmatpush.msra.mxu1 %v2785_v52 }
 0x26a   :  { %1189 = vmatpush.msrb.mxu2 %v2788_v60  ;;  %1209 = vmatpush.msrb.mxu3 %v2791_v1 }
 0x26b   :  { %1150 = vmatpush.msra.mxu0 %v2794_v59  ;;  %1170 = vmatpush.msra.mxu1 %v2797_v42 }
 0x26c   :  { %1190 = vmatpush.msrb.mxu2 %v2800_v5  ;;  %1210 = vmatpush.msrb.mxu3 %v2803_v53 }
 0x26d   :  { %1151 = vmatpush.msra.mxu0 %v2806_v6  ;;  %1171 = vmatpush.msra.mxu1 %v2809_v7 }
 0x26e   :  { %1191 = vmatpush.msrb.mxu2 %v2812_v8  ;;  %1211 = vmatpush.msrb.mxu3 %v2815_v9 }
 0x26f   :  { %1152 = vmatpush.msra.mxu0 %v2818_v11  ;;  %1172 = vmatpush.msra.mxu1 %v2821_v12 }
 0x270   :  { %1192 = vmatpush.msrb.mxu2 %v3361_v22  ;;  %1212 = vmatpush.msrb.mxu3 %v3362_v13 }
 0x271   :  { %1153 = vmatpush.msra.mxu0 %v3363_v17  ;;  %1173 = vmatpush.msra.mxu1 %v3364_v19 }
 0x272   :  { %1193 = vmatpush.msrb.mxu2 %v3365_v23  ;;  %1213 = vmatpush.msrb.mxu3 %v2931_v49 }
 0x273   :  { %1154 = vmatpush.msra.mxu0 %v3367_v39  ;;  %1174 = vmatpush.msra.mxu1 %v3368_v31 }
 0x274   :  { %1194 = vmatpush.msrb.mxu2 %v3369_v34  ;;  %1214 = vmatpush.msrb.mxu3 %v2937_v33 }
 0x275   :  { %1155 = vmatpush.msra.mxu0 %v3371_v38  ;;  %1175 = vmatpush.msra.mxu1 %v3372_v37 }
 0x276   :  { %1195 = vmatpush.msrb.mxu2 %v3373_v24  ;;  %1215 = vmatpush.msrb.mxu3 %v2943_v14 }
 0x277   :  { %1156 = vmatpush.msra.mxu0 %v3375_v26  ;;  %1176 = vmatpush.msra.mxu1 %v3376_v27 }
 0x278   :  { %1196 = vmatpush.msrb.mxu2 %v3377_v36  ;;  %1216 = vmatpush.msrb.mxu3 %v2949_v32  ;;  %v3387_v32 = vld [vmem:[#allocation46_spill] sm:$0xff]  ;;  %v3388_v36 = vld [vmem:[#allocation47_spill] sm:$0xff] }
 0x279   :  { %1157 = vmatpush.msra.mxu0 %v3379_v10  ;;  %1177 = vmatpush.msra.mxu1 %v2953_v20  ;;  %v2971_v20 = vld [vmem:[#allocation3 + $0x18] sm:$0xff] }
 0x27a   :  { %1197 = vmatpush.msrb.mxu2 %v2956_v28  ;;  %1217 = vmatpush.msrb.mxu3 %v2959_v30  ;;  %3386 = vst [vmem:[#allocation40_spill] sm:$0xff] %v2971_v20 }
 0x27b   :  { %1158 = vmatpush.msra.mxu0 %v2962_v21  ;;  %1178 = vmatpush.msra.mxu1 %v2965_v25  ;;  %v3389_v25 = vld [vmem:[#allocation56_spill] sm:$0xff] }
 0x27c   :  { %1198 = vmatpush.msrb.mxu2 %v2968_v18  ;;  %1218 = vmatpush.msrb.mxu3 %v2971_v20 }
 0x2d8   :  { %v858_v28 = vpop.f32.mrf.mxu0  ;;  %v878_v10 = vpop.f32.mrf.mxu1 }
 0x2d9   :  { %v921_v30 = vadd.f32 %v858_v28, %v3387_v32  ;;  %v922_v27 = vadd.f32 %v878_v10, %v3388_v36  ;;  %v3390_v36 = vld [vmem:[#allocation57_spill] sm:$0xff] }
 0x2db   :  { %v1752_v26 = vmul.f32 -1.442695, %v921_v30  ;;  %v1753_v21 = vmul.f32 -1.442695, %v922_v27 }
 0x2dd   :  { %1829 = vpow2.f32 %v1752_v26 }
 0x2de   :  { %1831 = vpow2.f32 %v1753_v21 }
 0x2df   :  { %v898_v14 = vpop.f32.mrf.mxu2  ;;  %v918_v20 = vpop.f32.mrf.mxu3 }
 0x2e0   :  { %v923_v24 = vadd.f32 %v898_v14, %v3389_v25  ;;  %v924_v10 = vadd.f32 %v918_v20, %v3390_v36 }
 0x2e2   :  { %v1754_v37 = vmul.f32 -1.442695, %v923_v24 }
 0x2e3   :  { %v1830_v38 = vpop.eup %1829 }
 0x2e4   :  { %v1832_v18 = vpop.eup %1831  ;;  %v934_v33 = vadd.f32 1.0, %v1830_v38  ;;  %1833 = vpow2.f32 %v1754_v37 }
 0x2e5   :  { %v935_v34 = vadd.f32 1.0, %v1832_v18 }
 0x2e6   :  { %1835 = vrcp.f32 %v934_v33  ;;  %v948_v24 = vand.u32 2147483648, %v934_v33  ;;  %v946_v37 = vand.u32 2147483647, %v934_v33  ;;  %vm942_vm7 = vweird.f32 %v934_v33 }
 0x2e7   :  { %1837 = vrcp.f32 %v935_v34  ;;  %v963_v25 = vand.u32 2147483648, %v935_v34  ;;  %v961_v39 = vand.u32 2147483647, %v935_v34  ;;  %vm957_vm8 = vweird.f32 %v935_v34 }
 0x2e8   :  { %v949_v36 = vor.u32 1.1754944e-38, %v948_v24  ;;  %vm947_vm11 = vcmp.eq.f32.partialorder %v946_v37, 8.507059e+37 }
 0x2e9   :  { %vm962_vm12 = vcmp.eq.f32.partialorder %v961_v39, 8.507059e+37 }
 0x2ea   :  { %v1834_v31 = vpop.eup %1833 }
 0x2eb   :  { %v936_v32 = vadd.f32 1.0, %v1834_v31 }
 0x2ec   :  { %v1836_v28 = vpop.eup %1835 }
 0x2ed   :  { %v1838_v27 = vpop.eup %1837  ;;  %v938_v26 = vmul.f32 %v1836_v28, %v934_v33  ;;  %1839 = vrcp.f32 %v936_v32  ;;  %vm943_vm5 = vweird.f32 %v1836_v28  ;;  %v978_v24 = vand.u32 2147483648, %v936_v32 }
 0x2ee   :  { %v953_v30 = vmul.f32 %v1838_v27, %v935_v34  ;;  %1841 = vtanh.f32 %v924_v10  ;;  %vm958_vm6 = vweird.f32 %v1838_v27  ;;  %vm944_vm9 = vmor %vm942_vm7, %vm943_vm5  ;;  %vm972_vm14 = vweird.f32 %v936_v32 }
 0x2ef   :  { %v939_v21 = vsub.f32 1.0, %v938_v26  ;;  %vm959_vm10 = vmor %vm957_vm8, %vm958_vm6  ;;  %v964_v26 = vor.u32 1.1754944e-38, %v963_v25  ;;  %v979_v37 = vor.u32 1.1754944e-38, %v978_v24  ;;  %v3409_v24 = vld [vmem:[#allocation27_spill] sm:$0xff] }
 0x2f0   :  { %v954_v14 = vsub.f32 1.0, %v953_v30 }
 0x2f1   :  { %v940_v38 = vmul.f32 %v1836_v28, %v939_v21 }
 0x2f2   :  { %v955_v18 = vmul.f32 %v1838_v27, %v954_v14 }
 0x2f3   :  { %v1840_v49 = vpop.eup %1839  ;;  %v941_v31 = vadd.f32 %v1836_v28, %v940_v38 }
 0x2f4   :  { %v968_v20 = vmul.f32 %v1840_v49, %v936_v32  ;;  %v956_v23 = vadd.f32 %v1838_v27, %v955_v18  ;;  %v1842_v10 = vpop.eup %1841  ;;  %vm973_vm13 = vweird.f32 %v1840_v49  ;;  %v3398_v18 = vld [vmem:[#allocation19_spill] sm:$0xff] }
 0x2f5   :  { %v945_v30 = vsel %vm944_vm9, %v1836_v28, %v941_v31  ;;  %v976_v28 = vand.u32 2147483647, %v936_v32  ;;  %vm974_vm15 = vmor %vm972_vm14, %vm973_vm13  ;;  %v3396_v32 = vld [vmem:[#allocation25_spill] sm:$0xff] }
 0x2f6   :  { %v969_v19 = vsub.f32 1.0, %v968_v20  ;;  %v950_v21 = vsel %vm947_vm11, %v949_v36, %v945_v30  ;;  %v960_v17 = vsel %vm959_vm10, %v1838_v27, %v956_v23  ;;  %v3397_v27 = vld [vmem:[#allocation16_spill] sm:$0xff]  ;;  %v3399_v31 = vld [vmem:[#allocation17_spill] sm:$0xff]  ;;  %v3400_v20 = vld [vmem:[#allocation34_spill] sm:$0xff] }
 0x2f7   :  { %v965_v14 = vsel %vm962_vm12, %v964_v26, %v960_v17  ;;  %v984_v13 = vmul.f32 %v1842_v10, %v950_v21  ;;  %vm977_vm0 = vcmp.eq.f32.partialorder %v976_v28, 8.507059e+37  ;;  %v3401_v36 = vld [vmem:[#allocation26_spill] sm:$0xff]  ;;  %v3402_v26 = vld [vmem:[#allocation20_spill] sm:$0xff]  ;;  %v3403_v30 = vld [vmem:[#allocation21_spill] sm:$0xff] }
 0x2f8   :  { %v983_v22 = vmul.f32 %v965_v14, %v2885_v35  ;;  %v970_v38 = vmul.f32 %v1840_v49, %v969_v19  ;;  %v3391_v35 = vld [vmem:[#allocation18_spill] sm:$0xff]  ;;  %v3404_v10 = vld [vmem:[#allocation28_spill] sm:$0xff]  ;;  %v3405_v21 = vld [vmem:[#allocation23_spill] sm:$0xff] }
 0x2f9   :  { %v3394_v19 = vld [vmem:[#allocation14_spill] sm:$0xff]  ;;  %v3406_v14 = vld [vmem:[#allocation33_spill] sm:$0xff]  ;;  %v3410_v28 = vld [vmem:[#allocation32_spill] sm:$0xff] }
 0x2fa   :  { %v2979_v33 = vadd.f32 %v984_v13, %v983_v22  ;;  %v971_v34 = vadd.f32 %v1840_v49, %v970_v38  ;;  %v3392_v22 = vld [vmem:[#allocation13_spill] sm:$0xff]  ;;  %v3393_v13 = vld [vmem:[#allocation15_spill] sm:$0xff]  ;;  %v3407_v38 = vld [vmem:[#allocation22_spill] sm:$0xff] }
 0x2fc   :  { %1843 = vtanh.f32 %v2979_v33  ;;  %v975_v25 = vsel %vm974_vm15, %v1840_v49, %v971_v34  ;;  %v3395_v49 = vld [vmem:[#allocation24_spill] sm:$0xff]  ;;  %v3408_v34 = vld [vmem:[#allocation29_spill] sm:$0xff] }
 0x2fd   :  { %v980_v39 = vsel %vm977_vm0, %v979_v37, %v975_v25  ;;  %v3411_v25 = vld [vmem:[#allocation36_spill] sm:$0xff]  ;;  %v3412_v37 = vld [vmem:[#allocation30_spill] sm:$0xff] }
 0x302   :  { %v1844_v23 = vpop.eup %1843 }
 0x303   :  { %v987_v17 = vmul.f32 %v1844_v23, %v980_v39  ;;  %v3413_v23 = vld [vmem:[#allocation31_spill] sm:$0xff] }
 0x304   :  { %v3414_v39 = vld [vmem:[#allocation35_spill] sm:$0xff] }
 0x305   :  { %1008 = vmatmul.f32.vlgmr.msrb.gmra.mxu0 %v987_v17  ;;  %1028 = vmatmul.f32.vlgmr.msrb.gmra.mxu1 %v987_v17 }
 0x306   :  { %1048 = vmatmul.f32.vlgmr.msra.gmra.mxu2 %v987_v17  ;;  %1068 = vmatmul.f32.vlgmr.msra.gmra.mxu3 %v987_v17  ;;  %v3415_v17 = vld [vmem:[#allocation37_spill] sm:$0xff] }
 0x307   :  { %1294 = vmatpush.msrb.mxu0 %v2710_v16  ;;  %1314 = vmatpush.msrb.mxu1 %v2713_v40 }
 0x308   :  { %1334 = vmatpush.msra.mxu2 %v2716_v41  ;;  %1354 = vmatpush.msra.mxu3 %v2719_v43 }
 0x309   :  { %1295 = vmatpush.msrb.mxu0 %v2722_v44  ;;  %1315 = vmatpush.msrb.mxu1 %v2725_v45 }
 0x30a   :  { %1335 = vmatpush.msra.mxu2 %v2728_v46  ;;  %1355 = vmatpush.msra.mxu3 %v2731_v47 }
 0x30b   :  { %1296 = vmatpush.msrb.mxu0 %v2734_v50  ;;  %1316 = vmatpush.msrb.mxu1 %v2737_v58 }
 0x30c   :  { %1336 = vmatpush.msra.mxu2 %v2740_v62  ;;  %1356 = vmatpush.msra.mxu3 %v2743_v55 }
 0x30d   :  { %1297 = vmatpush.msrb.mxu0 %v2746_v29  ;;  %1317 = vmatpush.msrb.mxu1 %v2749_v48 }
 0x30e   :  { %1337 = vmatpush.msra.mxu2 %v2752_v15  ;;  %1357 = vmatpush.msra.mxu3 %v2755_v63 }
 0x30f   :  { %1298 = vmatpush.msrb.mxu0 %v2758_v54  ;;  %1318 = vmatpush.msrb.mxu1 %v2761_v56 }
 0x310   :  { %1338 = vmatpush.msra.mxu2 %v2764_v57  ;;  %1358 = vmatpush.msra.mxu3 %v2767_v3 }
 0x311   :  { %1299 = vmatpush.msrb.mxu0 %v2770_v4  ;;  %1319 = vmatpush.msrb.mxu1 %v2773_v61 }
 0x312   :  { %1339 = vmatpush.msra.mxu2 %v2776_v51  ;;  %1359 = vmatpush.msra.mxu3 %v2779_v2 }
 0x313   :  { %1300 = vmatpush.msrb.mxu0 %v2782_v0  ;;  %1320 = vmatpush.msrb.mxu1 %v2785_v52 }
 0x314   :  { %1340 = vmatpush.msra.mxu2 %v2788_v60  ;;  %1360 = vmatpush.msra.mxu3 %v2791_v1 }
 0x315   :  { %1301 = vmatpush.msrb.mxu0 %v2794_v59  ;;  %1321 = vmatpush.msrb.mxu1 %v2797_v42 }
 0x316   :  { %1341 = vmatpush.msra.mxu2 %v2800_v5  ;;  %1361 = vmatpush.msra.mxu3 %v2803_v53 }
 0x317   :  { %1302 = vmatpush.msrb.mxu0 %v2806_v6  ;;  %1322 = vmatpush.msrb.mxu1 %v2809_v7 }
 0x318   :  { %1342 = vmatpush.msra.mxu2 %v2812_v8  ;;  %1362 = vmatpush.msra.mxu3 %v2815_v9 }
 0x319   :  { %1303 = vmatpush.msrb.mxu0 %v2818_v11  ;;  %1323 = vmatpush.msrb.mxu1 %v2821_v12 }
 0x31a   :  { %1343 = vmatpush.msra.mxu2 %v3391_v35  ;;  %1363 = vmatpush.msra.mxu3 %v3392_v22 }
 0x31b   :  { %1304 = vmatpush.msrb.mxu0 %v3393_v13  ;;  %1324 = vmatpush.msrb.mxu1 %v3394_v19 }
 0x31c   :  { %1344 = vmatpush.msra.mxu2 %v3395_v49  ;;  %1364 = vmatpush.msra.mxu3 %v3396_v32 }
 0x31d   :  { %1305 = vmatpush.msrb.mxu0 %v3397_v27  ;;  %1325 = vmatpush.msrb.mxu1 %v3398_v18 }
 0x31e   :  { %1345 = vmatpush.msra.mxu2 %v3399_v31  ;;  %1365 = vmatpush.msra.mxu3 %v3400_v20 }
 0x31f   :  { %1306 = vmatpush.msrb.mxu0 %v3401_v36  ;;  %1326 = vmatpush.msrb.mxu1 %v3402_v26 }
 0x320   :  { %1346 = vmatpush.msra.mxu2 %v3403_v30  ;;  %1366 = vmatpush.msra.mxu3 %v3404_v10  ;;  %v3417_v10 = vld [vmem:[#allocation50_spill] sm:$0xff]  ;;  %v3418_v30 = vld [vmem:[#allocation51_spill] sm:$0xff] }
 0x321   :  { %1307 = vmatpush.msrb.mxu0 %v3405_v21  ;;  %1327 = vmatpush.msrb.mxu1 %v3406_v14  ;;  %v3416_v21 = vld [vmem:[#allocation40_spill] sm:$0xff] }
 0x322   :  { %1347 = vmatpush.msra.mxu2 %v3407_v38  ;;  %1367 = vmatpush.msra.mxu3 %v3408_v34 }
 0x323   :  { %1308 = vmatpush.msrb.mxu0 %v3409_v24  ;;  %1328 = vmatpush.msrb.mxu1 %v3410_v28 }
 0x324   :  { %1348 = vmatpush.msra.mxu2 %v3411_v25  ;;  %1368 = vmatpush.msra.mxu3 %v3412_v37  ;;  %v3419_v37 = vld [vmem:[#allocation58_spill] sm:$0xff] }
 0x325   :  { %1309 = vmatpush.msrb.mxu0 %v3413_v23  ;;  %1329 = vmatpush.msrb.mxu1 %v3414_v39 }
 0x326   :  { %1349 = vmatpush.msra.mxu2 %v3415_v17  ;;  %1369 = vmatpush.msra.mxu3 %v3416_v21 }
 0x382   :  { %v1009_v14 = vpop.f32.mrf.mxu0  ;;  %v1029_v38 = vpop.f32.mrf.mxu1 }
 0x383   :  { %v1072_v34 = vadd.f32 %v1009_v14, %v3417_v10  ;;  %v1073_v24 = vadd.f32 %v1029_v38, %v3418_v30  ;;  %v3420_v30 = vld [vmem:[#allocation59_spill] sm:$0xff] }
 0x385   :  { %v1755_v26 = vmul.f32 -1.442695, %v1072_v34  ;;  %v1756_v28 = vmul.f32 -1.442695, %v1073_v24 }
 0x387   :  { %1845 = vpow2.f32 %v1755_v26 }
 0x388   :  { %1847 = vpow2.f32 %v1756_v28 }
 0x389   :  { %v1049_v25 = vpop.f32.mrf.mxu2  ;;  %v1069_v21 = vpop.f32.mrf.mxu3 }
 0x38a   :  { %v1074_v36 = vadd.f32 %v1049_v25, %v3419_v37  ;;  %v1075_v38 = vadd.f32 %v1069_v21, %v3420_v30 }
 0x38c   :  { %v1757_v23 = vmul.f32 -1.442695, %v1074_v36 }
 0x38d   :  { %v1846_v20 = vpop.eup %1845 }
 0x38e   :  { %v1848_v39 = vpop.eup %1847  ;;  %v1085_v31 = vadd.f32 1.0, %v1846_v20  ;;  %1849 = vpow2.f32 %v1757_v23 }
 0x38f   :  { %v1086_v17 = vadd.f32 1.0, %v1848_v39 }
 0x390   :  { %1851 = vrcp.f32 %v1085_v31  ;;  %v1099_v36 = vand.u32 2147483648, %v1085_v31  ;;  %v1097_v23 = vand.u32 2147483647, %v1085_v31  ;;  %vm1093_vm3 = vweird.f32 %v1085_v31 }
 0x391   :  { %1853 = vrcp.f32 %v1086_v17  ;;  %v1114_v37 = vand.u32 2147483648, %v1086_v17  ;;  %v1112_v27 = vand.u32 2147483647, %v1086_v17  ;;  %vm1108_vm4 = vweird.f32 %v1086_v17 }
 0x392   :  { %v1100_v30 = vor.u32 1.1754944e-38, %v1099_v36  ;;  %vm1098_vm7 = vcmp.eq.f32.partialorder %v1097_v23, 8.507059e+37 }
 0x393   :  { %vm1113_vm8 = vcmp.eq.f32.partialorder %v1112_v27, 8.507059e+37 }
 0x394   :  { %v1850_v18 = vpop.eup %1849 }
 0x395   :  { %v1087_v10 = vadd.f32 1.0, %v1850_v18 }
 0x396   :  { %v1852_v14 = vpop.eup %1851 }
 0x397   :  { %v1854_v34 = vpop.eup %1853  ;;  %v1089_v26 = vmul.f32 %v1852_v14, %v1085_v31  ;;  %1855 = vrcp.f32 %v1087_v10  ;;  %vm1094_vm1 = vweird.f32 %v1852_v14  ;;  %v1129_v36 = vand.u32 2147483648, %v1087_v10 }
 0x398   :  { %v1104_v24 = vmul.f32 %v1854_v34, %v1086_v17  ;;  %1857 = vtanh.f32 %v1075_v38  ;;  %vm1109_vm2 = vweird.f32 %v1854_v34  ;;  %vm1095_vm5 = vmor %vm1093_vm3, %vm1094_vm1  ;;  %vm1123_vm10 = vweird.f32 %v1087_v10 }
 0x399   :  { %v1090_v28 = vsub.f32 1.0, %v1089_v26  ;;  %vm1110_vm6 = vmor %vm1108_vm4, %vm1109_vm2  ;;  %v1115_v26 = vor.u32 1.1754944e-38, %v1114_v37  ;;  %v1130_v23 = vor.u32 1.1754944e-38, %v1129_v36 }
 0x39a   :  { %v1105_v25 = vsub.f32 1.0, %v1104_v24 }
 0x39b   :  { %v1091_v20 = vmul.f32 %v1852_v14, %v1090_v28 }
 0x39c   :  { %v1106_v39 = vmul.f32 %v1854_v34, %v1105_v25 }
 0x39d   :  { %v1856_v32 = vpop.eup %1855  ;;  %v1092_v18 = vadd.f32 %v1852_v14, %v1091_v20 }
 0x39e   :  { %v1119_v21 = vmul.f32 %v1856_v32, %v1087_v10  ;;  %v1107_v49 = vadd.f32 %v1854_v34, %v1106_v39  ;;  %v1858_v38 = vpop.eup %1857  ;;  %vm1124_vm9 = vweird.f32 %v1856_v32 }
 0x39f   :  { %v1096_v24 = vsel %vm1095_vm5, %v1852_v14, %v1092_v18  ;;  %v1127_v14 = vand.u32 2147483647, %v1087_v10  ;;  %vm1125_vm11 = vmor %vm1123_vm10, %vm1124_vm9  ;;  %v3450_v18 = vld [vmem:[#allocation61_spill] sm:$0xff] }
 0x3a0   :  { %v1120_v19 = vsub.f32 1.0, %v1119_v21  ;;  %v1101_v28 = vsel %vm1098_vm7, %v1100_v30, %v1096_v24  ;;  %v1111_v13 = vsel %vm1110_vm6, %v1854_v34, %v1107_v49 }
 0x3a1   :  { %v1116_v25 = vsel %vm1113_vm8, %v1115_v26, %v1111_v13  ;;  %v1135_v22 = vmul.f32 %v1858_v38, %v1101_v28  ;;  %vm1128_vm12 = vcmp.eq.f32.partialorder %v1127_v14, 8.507059e+37 }
 0x3a2   :  { %v1134_v35 = vmul.f32 %v1116_v25, %v2979_v33  ;;  %v1121_v20 = vmul.f32 %v1856_v32, %v1120_v19 }
 0x3a4   :  { %v3051_v31 = vadd.f32 %v1135_v22, %v1134_v35  ;;  %v1122_v17 = vadd.f32 %v1856_v32, %v1121_v20 }
 0x3a6   :  { %1859 = vtanh.f32 %v3051_v31  ;;  %v1126_v37 = vsel %vm1125_vm11, %v1856_v32, %v1122_v17 }
 0x3a7   :  { %v1131_v27 = vsel %vm1128_vm12, %v1130_v23, %v1126_v37 }
 0x3ac   :  { %v1860_v49 = vpop.eup %1859 }
 0x3ad   :  { %v1138_v13 = vmul.f32 %v1860_v49, %v1131_v27 }
 0x3af   :  { %1159 = vmatmul.f32.vlgmr.msra.gmra.mxu0 %v1138_v13  ;;  %1179 = vmatmul.f32.vlgmr.msra.gmra.mxu1 %v1138_v13 }
 0x3b0   :  { %1199 = vmatmul.f32.vlgmr.msrb.gmra.mxu2 %v1138_v13  ;;  %1219 = vmatmul.f32.vlgmr.msrb.gmra.mxu3 %v1138_v13 }
 0x3b1   :  { %1445 = vmatpush.msra.mxu0 %v2710_v16  ;;  %1465 = vmatpush.msra.mxu1 %v2713_v40  ;;  %v3421_v16 = vld [vmem:[#allocation18_spill] sm:$0xff]  ;;  %v3422_v40 = vld [vmem:[#allocation13_spill] sm:$0xff] }
 0x3b2   :  { %1485 = vmatpush.msrb.mxu2 %v2716_v41  ;;  %1505 = vmatpush.msrb.mxu3 %v2719_v43  ;;  %v3423_v41 = vld [vmem:[#allocation15_spill] sm:$0xff]  ;;  %v3424_v43 = vld [vmem:[#allocation14_spill] sm:$0xff] }
 0x3b3   :  { %1446 = vmatpush.msra.mxu0 %v2722_v44  ;;  %1466 = vmatpush.msra.mxu1 %v2725_v45  ;;  %v3425_v44 = vld [vmem:[#allocation24_spill] sm:$0xff]  ;;  %v3426_v45 = vld [vmem:[#allocation25_spill] sm:$0xff] }
 0x3b4   :  { %1486 = vmatpush.msrb.mxu2 %v2728_v46  ;;  %1506 = vmatpush.msrb.mxu3 %v2731_v47  ;;  %v3427_v46 = vld [vmem:[#allocation16_spill] sm:$0xff]  ;;  %v3428_v47 = vld [vmem:[#allocation19_spill] sm:$0xff] }
 0x3b5   :  { %1447 = vmatpush.msra.mxu0 %v2734_v50  ;;  %1467 = vmatpush.msra.mxu1 %v2737_v58  ;;  %v3429_v50 = vld [vmem:[#allocation17_spill] sm:$0xff]  ;;  %v3430_v58 = vld [vmem:[#allocation34_spill] sm:$0xff] }
 0x3b6   :  { %1487 = vmatpush.msrb.mxu2 %v2740_v62  ;;  %1507 = vmatpush.msrb.mxu3 %v2743_v55  ;;  %v3431_v62 = vld [vmem:[#allocation26_spill] sm:$0xff]  ;;  %v3432_v55 = vld [vmem:[#allocation20_spill] sm:$0xff] }
 0x3b7   :  { %1448 = vmatpush.msra.mxu0 %v2746_v29  ;;  %1468 = vmatpush.msra.mxu1 %v2749_v48  ;;  %v3433_v29 = vld [vmem:[#allocation21_spill] sm:$0xff]  ;;  %v3434_v48 = vld [vmem:[#allocation28_spill] sm:$0xff] }
 0x3b8   :  { %1488 = vmatpush.msrb.mxu2 %v2752_v15  ;;  %1508 = vmatpush.msrb.mxu3 %v2755_v63  ;;  %v3435_v15 = vld [vmem:[#allocation23_spill] sm:$0xff]  ;;  %v3436_v63 = vld [vmem:[#allocation33_spill] sm:$0xff] }
 0x3b9   :  { %1449 = vmatpush.msra.mxu0 %v2758_v54  ;;  %1469 = vmatpush.msra.mxu1 %v2761_v56  ;;  %v3437_v54 = vld [vmem:[#allocation22_spill] sm:$0xff]  ;;  %v3438_v56 = vld [vmem:[#allocation29_spill] sm:$0xff] }
 0x3ba   :  { %1489 = vmatpush.msrb.mxu2 %v2764_v57  ;;  %1509 = vmatpush.msrb.mxu3 %v2767_v3  ;;  %v3439_v57 = vld [vmem:[#allocation27_spill] sm:$0xff]  ;;  %v3440_v3 = vld [vmem:[#allocation32_spill] sm:$0xff] }
 0x3bb   :  { %1450 = vmatpush.msra.mxu0 %v2770_v4  ;;  %1470 = vmatpush.msra.mxu1 %v2773_v61  ;;  %v3441_v4 = vld [vmem:[#allocation36_spill] sm:$0xff]  ;;  %v3442_v61 = vld [vmem:[#allocation30_spill] sm:$0xff] }
 0x3bc   :  { %1490 = vmatpush.msrb.mxu2 %v2776_v51  ;;  %1510 = vmatpush.msrb.mxu3 %v2779_v2  ;;  %v3443_v51 = vld [vmem:[#allocation31_spill] sm:$0xff] }
 0x3bd   :  { %1451 = vmatpush.msra.mxu0 %v2782_v0  ;;  %1471 = vmatpush.msra.mxu1 %v2785_v52  ;;  %v3444_v2 = vld [vmem:[#allocation35_spill] sm:$0xff]  ;;  %v3445_v0 = vld [vmem:[#allocation37_spill] sm:$0xff]  ;;  %v3446_v52 = vld [vmem:[#allocation40_spill] sm:$0xff] }
 0x3be   :  { %1491 = vmatpush.msrb.mxu2 %v2788_v60  ;;  %1511 = vmatpush.msrb.mxu3 %v2791_v1 }
 0x3bf   :  { %1452 = vmatpush.msra.mxu0 %v2794_v59  ;;  %1472 = vmatpush.msra.mxu1 %v2797_v42  ;;  %v3447_v59 = vld [vmem:[#allocation54_spill] sm:$0xff] }
 0x3c0   :  { %1492 = vmatpush.msrb.mxu2 %v2800_v5  ;;  %1512 = vmatpush.msrb.mxu3 %v2803_v53  ;;  %v3448_v5 = vld [vmem:[#allocation55_spill] sm:$0xff] }
 0x3c1   :  { %1453 = vmatpush.msra.mxu0 %v2806_v6  ;;  %1473 = vmatpush.msra.mxu1 %v2809_v7 }
 0x3c2   :  { %1493 = vmatpush.msrb.mxu2 %v2812_v8  ;;  %1513 = vmatpush.msrb.mxu3 %v2815_v9  ;;  %v3449_v9 = vld [vmem:[#allocation60_spill] sm:$0xff] }
 0x3c3   :  { %1454 = vmatpush.msra.mxu0 %v2818_v11  ;;  %1474 = vmatpush.msra.mxu1 %v2821_v12 }
 0x3c4   :  { %1494 = vmatpush.msrb.mxu2 %v3421_v16  ;;  %1514 = vmatpush.msrb.mxu3 %v3422_v40 }
 0x3c5   :  { %1455 = vmatpush.msra.mxu0 %v3423_v41  ;;  %1475 = vmatpush.msra.mxu1 %v3424_v43 }
 0x3c6   :  { %1495 = vmatpush.msrb.mxu2 %v3425_v44  ;;  %1515 = vmatpush.msrb.mxu3 %v3426_v45 }
 0x3c7   :  { %1456 = vmatpush.msra.mxu0 %v3427_v46  ;;  %1476 = vmatpush.msra.mxu1 %v3428_v47 }
 0x3c8   :  { %1496 = vmatpush.msrb.mxu2 %v3429_v50  ;;  %1516 = vmatpush.msrb.mxu3 %v3430_v58 }
 0x3c9   :  { %1457 = vmatpush.msra.mxu0 %v3431_v62  ;;  %1477 = vmatpush.msra.mxu1 %v3432_v55 }
 0x3ca   :  { %1497 = vmatpush.msrb.mxu2 %v3433_v29  ;;  %1517 = vmatpush.msrb.mxu3 %v3434_v48 }
 0x3cb   :  { %1458 = vmatpush.msra.mxu0 %v3435_v15  ;;  %1478 = vmatpush.msra.mxu1 %v3436_v63 }
 0x3cc   :  { %1498 = vmatpush.msrb.mxu2 %v3437_v54  ;;  %1518 = vmatpush.msrb.mxu3 %v3438_v56 }
 0x3cd   :  { %1459 = vmatpush.msra.mxu0 %v3439_v57  ;;  %1479 = vmatpush.msra.mxu1 %v3440_v3 }
 0x3ce   :  { %1499 = vmatpush.msrb.mxu2 %v3441_v4  ;;  %1519 = vmatpush.msrb.mxu3 %v3442_v61  ;;  %v3451_v61 = vld [vmem:[#allocation38_spill] sm:$0xff] }
 0x3cf   :  { %1460 = vmatpush.msra.mxu0 %v3443_v51  ;;  %1480 = vmatpush.msra.mxu1 %v3444_v2  ;;  %v3452_v2 = vld [vmem:[#allocation39_spill] sm:$0xff] }
 0x3d0   :  { %1500 = vmatpush.msrb.mxu2 %v3445_v0  ;;  %1520 = vmatpush.msrb.mxu3 %v3446_v52 }
 0x42c   :  { %v1160_v60 = vpop.f32.mrf.mxu0  ;;  %v1180_v1 = vpop.f32.mrf.mxu1 }
 0x42d   :  { %v1223_v42 = vadd.f32 %v1160_v60, %v3447_v59  ;;  %v1224_v53 = vadd.f32 %v1180_v1, %v3448_v5  ;;  %v3453_v59 = vld [vmem:[#allocation62_spill] sm:$0xff] }
 0x42f   :  { %v1758_v6 = vmul.f32 -1.442695, %v1223_v42  ;;  %v1759_v7 = vmul.f32 -1.442695, %v1224_v53 }
 0x431   :  { %1861 = vpow2.f32 %v1758_v6 }
 0x432   :  { %1863 = vpow2.f32 %v1759_v7 }
 0x433   :  { %v1200_v8 = vpop.f32.mrf.mxu2  ;;  %v1220_v32 = vpop.f32.mrf.mxu3 }
 0x434   :  { %v1225_v11 = vadd.f32 %v1200_v8, %v3449_v9  ;;  %v1226_v21 = vadd.f32 %v1220_v32, %v3450_v18 }
 0x436   :  { %v1760_v12 = vmul.f32 -1.442695, %v1225_v11 }
 0x437   :  { %v1862_v33 = vpop.eup %1861 }
 0x438   :  { %v1864_v35 = vpop.eup %1863  ;;  %v1236_v22 = vadd.f32 1.0, %v1862_v33  ;;  %1865 = vpow2.f32 %v1760_v12 }
 0x439   :  { %v1237_v19 = vadd.f32 1.0, %v1864_v35  ;;  %v3454_v35 = vld [vmem:[#allocation63_spill] sm:$0xff] }
 0x43a   :  { %1867 = vrcp.f32 %v1236_v22  ;;  %v1250_v25 = vand.u32 2147483648, %v1236_v22  ;;  %v1248_v36 = vand.u32 2147483647, %v1236_v22  ;;  %vm1244_vm15 = vweird.f32 %v1236_v22 }
 0x43b   :  { %1869 = vrcp.f32 %v1237_v19  ;;  %v1265_v20 = vand.u32 2147483648, %v1237_v19  ;;  %v1263_v37 = vand.u32 2147483647, %v1237_v19  ;;  %vm1259_vm0 = vweird.f32 %v1237_v19 }
 0x43c   :  { %v1251_v13 = vor.u32 1.1754944e-38, %v1250_v25  ;;  %vm1249_vm3 = vcmp.eq.f32.partialorder %v1248_v36, 8.507059e+37 }
 0x43d   :  { %v1266_v40 = vor.u32 1.1754944e-38, %v1265_v20  ;;  %vm1264_vm4 = vcmp.eq.f32.partialorder %v1263_v37, 8.507059e+37 }
 0x43e   :  { %v1866_v10 = vpop.eup %1865 }
 0x43f   :  { %v1238_v34 = vadd.f32 1.0, %v1866_v10 }
 0x440   :  { %v1868_v39 = vpop.eup %1867 }
 0x441   :  { %v1870_v30 = vpop.eup %1869  ;;  %v1240_v26 = vmul.f32 %v1868_v39, %v1236_v22  ;;  %1871 = vrcp.f32 %v1238_v34  ;;  %vm1245_vm13 = vweird.f32 %v1868_v39  ;;  %v1280_v48 = vand.u32 2147483648, %v1238_v34 }
 0x442   :  { %v1255_v24 = vmul.f32 %v1870_v30, %v1237_v19  ;;  %1873 = vtanh.f32 %v1226_v21  ;;  %vm1260_vm14 = vweird.f32 %v1870_v30  ;;  %vm1246_vm1 = vmor %vm1244_vm15, %vm1245_vm13  ;;  %vm1274_vm6 = vweird.f32 %v1238_v34 }
 0x443   :  { %v1241_v38 = vsub.f32 1.0, %v1240_v26  ;;  %vm1261_vm2 = vmor %vm1259_vm0, %vm1260_vm14  ;;  %v1278_v15 = vand.u32 2147483647, %v1238_v34  ;;  %v1281_v54 = vor.u32 1.1754944e-38, %v1280_v48 }
 0x444   :  { %v1256_v28 = vsub.f32 1.0, %v1255_v24 }
 0x445   :  { %v1242_v17 = vmul.f32 %v1868_v39, %v1241_v38  ;;  %vm1279_vm8 = vcmp.eq.f32.partialorder %v1278_v15, 8.507059e+37  ;;  %v1606_v15 = vld [vmem:[#allocation6 + $0x70] sm:$0xff] }
 0x446   :  { %v1257_v14 = vmul.f32 %v1870_v30, %v1256_v28 }
 0x447   :  { %v1872_v23 = vpop.eup %1871  ;;  %v1243_v49 = vadd.f32 %v1868_v39, %v1242_v17 }
 0x448   :  { %v1270_v27 = vmul.f32 %v1872_v23, %v1238_v34  ;;  %v1258_v16 = vadd.f32 %v1870_v30, %v1257_v14  ;;  %v1874_v43 = vpop.eup %1873  ;;  %vm1275_vm5 = vweird.f32 %v1872_v23 }
 0x449   :  { %v1247_v41 = vsel %vm1246_vm1, %v1868_v39, %v1243_v49  ;;  %vm1276_vm7 = vmor %vm1274_vm6, %vm1275_vm5 }
 0x44a   :  { %v1271_v44 = vsub.f32 1.0, %v1270_v27  ;;  %v1252_v45 = vsel %vm1249_vm3, %v1251_v13, %v1247_v41  ;;  %v1262_v46 = vsel %vm1261_vm2, %v1870_v30, %v1258_v16 }
 0x44b   :  { %v1267_v47 = vsel %vm1264_vm4, %v1266_v40, %v1262_v46  ;;  %v1286_v50 = vmul.f32 %v1874_v43, %v1252_v45 }
 0x44c   :  { %v1285_v58 = vmul.f32 %v1267_v47, %v3051_v31  ;;  %v1272_v62 = vmul.f32 %v1872_v23, %v1271_v44 }
 0x44e   :  { %v3123_v55 = vadd.f32 %v1286_v50, %v1285_v58  ;;  %v1273_v29 = vadd.f32 %v1872_v23, %v1272_v62 }
 0x450   :  { %1875 = vtanh.f32 %v3123_v55  ;;  %v1277_v63 = vsel %vm1276_vm7, %v1872_v23, %v1273_v29 }
 0x451   :  { %v1282_v57 = vsel %vm1279_vm8, %v1281_v54, %v1277_v63  ;;  %v1605_v63 = vld [vmem:[#allocation6 + $0x68] sm:$0xff]  ;;  %v1604_v54 = vld [vmem:[#allocation6 + $0x60] sm:$0xff] }
 0x456   :  { %v1876_v56 = vpop.eup %1875 }
 0x457   :  { %v1289_v3 = vmul.f32 %v1876_v56, %v1282_v57  ;;  %v1603_v56 = vld [vmem:[#allocation6 + $0x58] sm:$0xff]  ;;  %v1602_v57 = vld [vmem:[#allocation6 + $0x50] sm:$0xff] }
 0x459   :  { %1310 = vmatmul.f32.vlgmr.msrb.gmra.mxu0 %v1289_v3  ;;  %1330 = vmatmul.f32.vlgmr.msrb.gmra.mxu1 %v1289_v3 }
 0x45a   :  { %1350 = vmatmul.f32.vlgmr.msra.gmra.mxu2 %v1289_v3  ;;  %1370 = vmatmul.f32.vlgmr.msra.gmra.mxu3 %v1289_v3  ;;  %v1601_v3 = vld [vmem:[#allocation6 + $0x48] sm:$0xff] }
 0x4d6   :  { %v1311_v31 = vpop.f32.mrf.mxu0  ;;  %v1331_v4 = vpop.f32.mrf.mxu1 }
 0x4d7   :  { %v1374_v51 = vadd.f32 %v1311_v31, %v3451_v61  ;;  %v1375_v0 = vadd.f32 %v1331_v4, %v3452_v2  ;;  %v1600_v31 = vld [vmem:[#allocation6 + $0x40] sm:$0xff]  ;;  %v1599_v4 = vld [vmem:[#allocation6 + $0x38] sm:$0xff]  ;;  %v1598_v61 = vld [vmem:[#allocation6 + $0x30] sm:$0xff] }
 0x4d9   :  { %v1761_v52 = vmul.f32 -1.442695, %v1374_v51  ;;  %v1762_v60 = vmul.f32 -1.442695, %v1375_v0  ;;  %v3455_v0 = vld [vmem:[#allocation42_spill] sm:$0xff] }
 0x4db   :  { %1877 = vpow2.f32 %v1761_v52 }
 0x4dc   :  { %1879 = vpow2.f32 %v1762_v60  ;;  %v3456_v60 = vld [vmem:[#allocation43_spill] sm:$0xff] }
 0x4dd   :  { %v1351_v1 = vpop.f32.mrf.mxu2  ;;  %v1371_v9 = vpop.f32.mrf.mxu3 }
 0x4de   :  { %v1376_v42 = vadd.f32 %v1351_v1, %v3453_v59  ;;  %v1377_v22 = vadd.f32 %v1371_v9, %v3454_v35  ;;  %v1597_v59 = vld [vmem:[#allocation6 + $0x28] sm:$0xff] }
 0x4df   :  { %v1593_v9 = vld [vmem:[#allocation6 + $0x8] sm:$0xff] }
 0x4e0   :  { %v1763_v5 = vmul.f32 -1.442695, %v1376_v42 }
 0x4e1   :  { %v1878_v53 = vpop.eup %1877 }
 0x4e2   :  { %v1880_v6 = vpop.eup %1879  ;;  %v1387_v7 = vadd.f32 1.0, %v1878_v53  ;;  %1881 = vpow2.f32 %v1763_v5  ;;  %v1596_v53 = vld [vmem:[#allocation6 + $0x20] sm:$0xff] }
 0x4e3   :  { %v1388_v8 = vadd.f32 1.0, %v1880_v6  ;;  %v1595_v6 = vld [vmem:[#allocation6 + $0x18] sm:$0xff] }
 0x4e4   :  { %1883 = vrcp.f32 %v1387_v7  ;;  %v1401_v18 = vand.u32 2147483648, %v1387_v7  ;;  %v1399_v26 = vand.u32 2147483647, %v1387_v7  ;;  %vm1395_vm11 = vweird.f32 %v1387_v7 }
 0x4e5   :  { %1885 = vrcp.f32 %v1388_v8  ;;  %v1416_v21 = vand.u32 2147483648, %v1388_v8  ;;  %v1414_v38 = vand.u32 2147483647, %v1388_v8  ;;  %vm1410_vm12 = vweird.f32 %v1388_v8 }
 0x4e6   :  { %v1402_v17 = vor.u32 1.1754944e-38, %v1401_v18  ;;  %vm1400_vm15 = vcmp.eq.f32.partialorder %v1399_v26, 8.507059e+37 }
 0x4e7   :  { %v1417_v14 = vor.u32 1.1754944e-38, %v1416_v21  ;;  %vm1415_vm0 = vcmp.eq.f32.partialorder %v1414_v38, 8.507059e+37 }
 0x4e8   :  { %v1882_v11 = vpop.eup %1881 }
 0x4e9   :  { %v1389_v12 = vadd.f32 1.0, %v1882_v11  ;;  %v3457_v11 = vld [vmem:[#allocation64_spill] sm:$0xff] }
 0x4ea   :  { %v1884_v33 = vpop.eup %1883 }
 0x4eb   :  { %v1886_v19 = vpop.eup %1885  ;;  %v1391_v32 = vmul.f32 %v1884_v33, %v1387_v7  ;;  %1887 = vrcp.f32 %v1389_v12  ;;  %vm1396_vm9 = vweird.f32 %v1884_v33  ;;  %v1431_v46 = vand.u32 2147483648, %v1389_v12  ;;  %v1594_v7 = vld [vmem:[#allocation6 + $0x10] sm:$0xff] }
 0x4ec   :  { %v1406_v10 = vmul.f32 %v1886_v19, %v1388_v8  ;;  %1889 = vtanh.f32 %v1377_v22  ;;  %vm1411_vm10 = vweird.f32 %v1886_v19  ;;  %vm1397_vm13 = vmor %vm1395_vm11, %vm1396_vm9  ;;  %vm1425_vm2 = vweird.f32 %v1389_v12 }
 0x4ed   :  { %v1392_v34 = vsub.f32 1.0, %v1391_v32  ;;  %vm1412_vm14 = vmor %vm1410_vm12, %vm1411_vm10  ;;  %v1429_v47 = vand.u32 2147483647, %v1389_v12  ;;  %v1432_v58 = vor.u32 1.1754944e-38, %v1431_v46 }
 0x4ee   :  { %v1407_v39 = vsub.f32 1.0, %v1406_v10 }
 0x4ef   :  { %v1393_v30 = vmul.f32 %v1884_v33, %v1392_v34  ;;  %vm1430_vm4 = vcmp.eq.f32.partialorder %v1429_v47, 8.507059e+37 }
 0x4f0   :  { %v1408_v24 = vmul.f32 %v1886_v19, %v1407_v39 }
 0x4f1   :  { %v1888_v28 = vpop.eup %1887  ;;  %v1394_v25 = vadd.f32 %v1884_v33, %v1393_v30  ;;  %v3458_v30 = vld [vmem:[#allocation65_spill] sm:$0xff] }
 0x4f2   :  { %v1421_v20 = vmul.f32 %v1888_v28, %v1389_v12  ;;  %v1409_v36 = vadd.f32 %v1886_v19, %v1408_v24  ;;  %v1890_v23 = vpop.eup %1889  ;;  %vm1426_vm1 = vweird.f32 %v1888_v28 }
 0x4f3   :  { %v1398_v37 = vsel %vm1397_vm13, %v1884_v33, %v1394_v25  ;;  %vm1427_vm3 = vmor %vm1425_vm2, %vm1426_vm1  ;;  %v1592_v33 = vld [vmem:[#allocation6] sm:$0xff] }
 0x4f4   :  { %v1422_v49 = vsub.f32 1.0, %v1421_v20  ;;  %v1403_v27 = vsel %vm1400_vm15, %v1402_v17, %v1398_v37  ;;  %v1413_v13 = vsel %vm1412_vm14, %v1886_v19, %v1409_v36 }
 0x4f5   :  { %v1418_v16 = vsel %vm1415_vm0, %v1417_v14, %v1413_v13  ;;  %v1437_v40 = vmul.f32 %v1890_v23, %v1403_v27 }
 0x4f6   :  { %v1436_v41 = vmul.f32 %v1418_v16, %v3123_v55  ;;  %v1423_v43 = vmul.f32 %v1888_v28, %v1422_v49  ;;  %v1607_v55 = vld [vmem:[#allocation6 + $0x78] sm:$0xff] }
 0x4f7   :  { %1612 = vmatpush.msrb.mxu0 %v1607_v55 }
 0x4f8   :  { %v3131_v44 = vadd.f32 %v1437_v40, %v1436_v41  ;;  %v1424_v45 = vadd.f32 %v1888_v28, %v1423_v43 }
 0x4f9   :  { %1613 = vmatpush.msrb.mxu0 %v1606_v15 }
 0x4fa   :  { %1891 = vtanh.f32 %v3131_v44  ;;  %v1428_v50 = vsel %vm1427_vm3, %v1888_v28, %v1424_v45 }
 0x4fb   :  { %v1433_v29 = vsel %vm1430_vm4, %v1432_v58, %v1428_v50  ;;  %1614 = vmatpush.msrb.mxu0 %v1605_v63 }
 0x4fd   :  { %1615 = vmatpush.msrb.mxu0 %v1604_v54 }
 0x4ff   :  { %1616 = vmatpush.msrb.mxu0 %v1603_v56 }
 0x500   :  { %v1892_v62 = vpop.eup %1891 }
 0x501   :  { %v1440_v48 = vmul.f32 %v1892_v62, %v1433_v29  ;;  %1617 = vmatpush.msrb.mxu0 %v1602_v57 }
 0x503   :  { %1461 = vmatmul.f32.vlgmr.msra.gmra.mxu0 %v1440_v48  ;;  %1481 = vmatmul.f32.vlgmr.msra.gmra.mxu1 %v1440_v48 }
 0x504   :  { %1501 = vmatmul.f32.vlgmr.msrb.gmra.mxu2 %v1440_v48  ;;  %1521 = vmatmul.f32.vlgmr.msrb.gmra.mxu3 %v1440_v48 }
 0x505   :  { %1618 = vmatpush.msrb.mxu0 %v1601_v3 }
 0x507   :  { %1619 = vmatpush.msrb.mxu0 %v1600_v31 }
 0x509   :  { %1620 = vmatpush.msrb.mxu0 %v1599_v4 }
 0x50b   :  { %1621 = vmatpush.msrb.mxu0 %v1598_v61 }
 0x50d   :  { %1622 = vmatpush.msrb.mxu0 %v1597_v59  ;;  %v1660_v59 = vld [vmem:[#allocation8 + $0x40] sm:$0xff] }
 0x50f   :  { %1623 = vmatpush.msrb.mxu0 %v1596_v53  ;;  %v1657_v53 = vld [vmem:[#allocation8 + $0x28] sm:$0xff] }
 0x511   :  { %1624 = vmatpush.msrb.mxu0 %v1595_v6  ;;  %v1656_v6 = vld [vmem:[#allocation8 + $0x20] sm:$0xff] }
 0x513   :  { %1625 = vmatpush.msrb.mxu0 %v1594_v7  ;;  %v1655_v7 = vld [vmem:[#allocation8 + $0x18] sm:$0xff] }
 0x515   :  { %1626 = vmatpush.msrb.mxu0 %v1593_v9  ;;  %v1779_v9 = vld [vmem:[%s3153_s5] ss:$0 sm:$0xff] }
 0x517   :  { %1627 = vmatpush.msrb.mxu0 %v1592_v33 }
 0x580   :  { %v1462_v51 = vpop.f32.mrf.mxu0  ;;  %v1482_v2 = vpop.f32.mrf.mxu1 }
 0x581   :  { %v1525_v52 = vadd.f32 %v1462_v51, %v3455_v0  ;;  %v1526_v1 = vadd.f32 %v1482_v2, %v3456_v60  ;;  %v1667_v51 = vld [vmem:[#allocation8 + $0x78] sm:$0xff]  ;;  %v1666_v2 = vld [vmem:[#allocation8 + $0x70] sm:$0xff]  ;;  %v1664_v0 = vld [vmem:[#allocation8 + $0x60] sm:$0xff] }
 0x582   :  { %1672 = vmatpush.msrb.mxu1 %v1667_v51  ;;  %v1662_v60 = vld [vmem:[#allocation8 + $0x50] sm:$0xff] }
 0x583   :  { %v1764_v42 = vmul.f32 -1.442695, %v1525_v52  ;;  %v1765_v5 = vmul.f32 -1.442695, %v1526_v1  ;;  %v1663_v52 = vld [vmem:[#allocation8 + $0x58] sm:$0xff]  ;;  %v1661_v1 = vld [vmem:[#allocation8 + $0x48] sm:$0xff] }
 0x584   :  { %1673 = vmatpush.msrb.mxu1 %v1666_v2 }
 0x585   :  { %1893 = vpow2.f32 %v1764_v42  ;;  %v1659_v42 = vld [vmem:[#allocation8 + $0x38] sm:$0xff] }
 0x586   :  { %1895 = vpow2.f32 %v1765_v5  ;;  %v1658_v5 = vld [vmem:[#allocation8 + $0x30] sm:$0xff] }
 0x587   :  { %v1502_v8 = vpop.f32.mrf.mxu2  ;;  %v1522_v34 = vpop.f32.mrf.mxu3 }
 0x588   :  { %v1527_v12 = vadd.f32 %v1502_v8, %v3457_v11  ;;  %v1528_v26 = vadd.f32 %v1522_v34, %v3458_v30  ;;  %v1654_v8 = vld [vmem:[#allocation8 + $0x10] sm:$0xff]  ;;  %v1653_v11 = vld [vmem:[#allocation8 + $0x8] sm:$0xff] }
 0x58a   :  { %v1766_v35 = vmul.f32 -1.442695, %v1527_v12  ;;  %v1652_v12 = vld [vmem:[#allocation8] sm:$0xff] }
 0x58b   :  { %v1894_v22 = vpop.eup %1893 }
 0x58c   :  { %v1896_v19 = vpop.eup %1895  ;;  %v1538_v32 = vadd.f32 1.0, %v1894_v22  ;;  %1897 = vpow2.f32 %v1766_v35 }
 0x58d   :  { %v1539_v10 = vadd.f32 1.0, %v1896_v19 }
 0x58e   :  { %1899 = vrcp.f32 %v1538_v32  ;;  %v1552_v17 = vand.u32 2147483648, %v1538_v32  ;;  %v1550_v37 = vand.u32 2147483647, %v1538_v32  ;;  %vm1546_vm7 = vweird.f32 %v1538_v32 }
 0x58f   :  { %1901 = vrcp.f32 %v1539_v10  ;;  %v1567_v36 = vand.u32 2147483648, %v1539_v10  ;;  %v1565_v49 = vand.u32 2147483647, %v1539_v10  ;;  %vm1561_vm8 = vweird.f32 %v1539_v10 }
 0x590   :  { %v1553_v40 = vor.u32 1.1754944e-38, %v1552_v17  ;;  %vm1551_vm11 = vcmp.eq.f32.partialorder %v1550_v37, 8.507059e+37 }
 0x591   :  { %v1568_v43 = vor.u32 1.1754944e-38, %v1567_v36  ;;  %vm1566_vm12 = vcmp.eq.f32.partialorder %v1565_v49, 8.507059e+37 }
 0x592   :  { %v1898_v39 = vpop.eup %1897 }
 0x593   :  { %v1540_v18 = vadd.f32 1.0, %v1898_v39 }
 0x594   :  { %v1900_v21 = vpop.eup %1899 }
 0x595   :  { %v1902_v24 = vpop.eup %1901  ;;  %v1542_v38 = vmul.f32 %v1900_v21, %v1538_v32  ;;  %1903 = vrcp.f32 %v1540_v18  ;;  %vm1547_vm5 = vweird.f32 %v1900_v21  ;;  %v1582_v54 = vand.u32 2147483648, %v1540_v18 }
 0x596   :  { %v1557_v28 = vmul.f32 %v1902_v24, %v1539_v10  ;;  %1905 = vtanh.f32 %v1528_v26  ;;  %vm1562_vm6 = vweird.f32 %v1902_v24  ;;  %vm1548_vm9 = vmor %vm1546_vm7, %vm1547_vm5  ;;  %vm1576_vm14 = vweird.f32 %v1540_v18 }
 0x597   :  { %v1543_v25 = vsub.f32 1.0, %v1542_v38  ;;  %vm1563_vm10 = vmor %vm1561_vm8, %vm1562_vm6  ;;  %v1580_v56 = vand.u32 2147483647, %v1540_v18  ;;  %v1583_v3 = vor.u32 1.1754944e-38, %v1582_v54 }
 0x598   :  { %v1558_v20 = vsub.f32 1.0, %v1557_v28 }
 0x599   :  { %v1544_v14 = vmul.f32 %v1900_v21, %v1543_v25  ;;  %vm1581_vm0 = vcmp.eq.f32.partialorder %v1580_v56, 8.507059e+37 }
 0x59a   :  { %v1559_v23 = vmul.f32 %v1902_v24, %v1558_v20  ;;  %v1780_v20 = vld [vmem:[%s3155_s7] ss:$0 sm:$0xff] }
 0x59b   :  { %v1904_v27 = vpop.eup %1903  ;;  %v1545_v13 = vadd.f32 %v1900_v21, %v1544_v14 }
 0x59c   :  { %v1572_v16 = vmul.f32 %v1904_v27, %v1540_v18  ;;  %v1560_v41 = vadd.f32 %v1902_v24, %v1559_v23  ;;  %v1906_v46 = vpop.eup %1905  ;;  %vm1577_vm13 = vweird.f32 %v1904_v27 }
 0x59d   :  { %v1549_v45 = vsel %vm1548_vm9, %v1900_v21, %v1545_v13  ;;  %vm1578_vm15 = vmor %vm1576_vm14, %vm1577_vm13 }
 0x59e   :  { %v1573_v47 = vsub.f32 1.0, %v1572_v16  ;;  %v1554_v50 = vsel %vm1551_vm11, %v1553_v40, %v1549_v45  ;;  %v1564_v58 = vsel %vm1563_vm10, %v1902_v24, %v1560_v41 }
 0x59f   :  { %v1569_v62 = vsel %vm1566_vm12, %v1568_v43, %v1564_v58  ;;  %v1588_v29 = vmul.f32 %v1906_v46, %v1554_v50 }
 0x5a0   :  { %v1587_v48 = vmul.f32 %v1569_v62, %v3131_v44  ;;  %v1574_v55 = vmul.f32 %v1904_v27, %v1573_v47  ;;  %v1665_v44 = vld [vmem:[#allocation8 + $0x68] sm:$0xff] }
 0x5a1   :  { %1674 = vmatpush.msrb.mxu1 %v1665_v44 }
 0x5a2   :  { %v1589_v15 = vadd.f32 %v1588_v29, %v1587_v48  ;;  %v1575_v63 = vadd.f32 %v1904_v27, %v1574_v55 }
 0x5a3   :  { %1675 = vmatpush.msrb.mxu1 %v1664_v0 }
 0x5a4   :  { %1907 = vtanh.f32 %v1589_v15  ;;  %v1579_v57 = vsel %vm1578_vm15, %v1904_v27, %v1575_v63 }
 0x5a5   :  { %v1584_v4 = vsel %vm1581_vm0, %v1583_v3, %v1579_v57  ;;  %1676 = vmatpush.msrb.mxu1 %v1663_v52 }
 0x5a7   :  { %1677 = vmatpush.msrb.mxu1 %v1662_v60 }
 0x5a9   :  { %1678 = vmatpush.msrb.mxu1 %v1661_v1 }
 0x5aa   :  { %v1908_v31 = vpop.eup %1907 }
 0x5ab   :  { %v1591_v61 = vmul.f32 %v1908_v31, %v1584_v4  ;;  %1679 = vmatpush.msrb.mxu1 %v1660_v59 }
 0x5ad   :  { %1628 = vmatmul.f32.vlgmr.msrb.gmra.mxu0 %v1591_v61  ;;  %1680 = vmatpush.msrb.mxu1 %v1659_v42 }
 0x5af   :  { %1681 = vmatpush.msrb.mxu1 %v1658_v5 }
 0x5b1   :  { %1682 = vmatpush.msrb.mxu1 %v1657_v53 }
 0x5b3   :  { %1683 = vmatpush.msrb.mxu1 %v1656_v6 }
 0x5b5   :  { %1684 = vmatpush.msrb.mxu1 %v1655_v7 }
 0x5b7   :  { %1685 = vmatpush.msrb.mxu1 %v1654_v8 }
 0x5b9   :  { %1686 = vmatpush.msrb.mxu1 %v1653_v11 }
 0x5bb   :  { %1687 = vmatpush.msrb.mxu1 %v1652_v12 }
 0x62a   :  { %v1629_v33 = vpop.f32.mrf.mxu0 }
 0x62b   :  { %v1630_v35 = vadd.f32 %v1779_v9, %v1629_v33 }
 0x62d   :  { %v1767_v22 = vmul.f32 -1.442695, %v1630_v35 }
 0x62f   :  { %1909 = vpow2.f32 %v1767_v22 }
 0x635   :  { %v1910_v19 = vpop.eup %1909 }
 0x636   :  { %v1635_v32 = vadd.f32 1.0, %v1910_v19 }
 0x638   :  { %1911 = vrcp.f32 %v1635_v32  ;;  %v1647_v18 = vand.u32 2147483648, %v1635_v32  ;;  %v1645_v30 = vand.u32 2147483647, %v1635_v32  ;;  %vm1641_vm2 = vweird.f32 %v1635_v32 }
 0x63a   :  { %v1648_v24 = vor.u32 1.1754944e-38, %v1647_v18  ;;  %vm1646_vm4 = vcmp.eq.f32.partialorder %v1645_v30, 8.507059e+37 }
 0x63e   :  { %v1912_v10 = vpop.eup %1911 }
 0x63f   :  { %v1637_v34 = vmul.f32 %v1912_v10, %v1635_v32  ;;  %vm1642_vm1 = vweird.f32 %v1912_v10 }
 0x640   :  { %vm1643_vm3 = vmor %vm1641_vm2, %vm1642_vm1 }
 0x641   :  { %v1638_v39 = vsub.f32 1.0, %v1637_v34 }
 0x643   :  { %v1639_v21 = vmul.f32 %v1912_v10, %v1638_v39 }
 0x645   :  { %v1640_v26 = vadd.f32 %v1912_v10, %v1639_v21 }
 0x647   :  { %v1644_v38 = vsel %vm1643_vm3, %v1912_v10, %v1640_v26 }
 0x648   :  { %v1649_v28 = vsel %vm1646_vm4, %v1648_v24, %v1644_v38 }
 0x649   :  { %v1651_v25 = vmul.f32 %v1649_v28, %v1630_v35 }
 0x64b   :  { %1688 = vmatmul.f32.vlgmr.msrb.gmra.mxu1 %v1651_v25 }
 0x6c8   :  { %v1689_v17 = vpop.f32.mrf.mxu1 }
 0x6c9   :  { %v1690_v36 = vadd.f32 %v1780_v20, %v1689_v17 }
 0x6cb   :  { %1692 = vst [vmem:[#allocation9] sm:$0xff] %v1690_v36 }
 0x6cc   :  { %1703 = dma.vmem_to_hbm [thread:$0]  %s1699_s24, 128, %s1701_s27, [#allocation5]  }
 0x6cd   :  { %2077 = dma.done.wait [#allocation5], 128  }
 0x6ce   :  { %2078 = vsyncadd [#allocation5], 4294967168 }
 0x6cf   :  { %1708 = vsyncpa [#allocation4], 1 }
 0x6d0   :  { %1709 = vsyncpa [#allocation7], 1 }
 0x6d1   :  { %1710 = vsyncpa [#allocation5], 1 }

</bundles_post_ra>
